<compile_context>
chip_gen: v7x
topology: tpu7x:2x2x1
jax: 0.10.0
libtpu: 0.0.40
codegen_flags: <defaults>
</compile_context>

<pallas_src>
import jax
import jax.numpy as jnp
from jax import lax
from jax.experimental import pallas as pl
from jax.experimental.pallas import tpu as pltpu


# ----------------------------------------------------------------------------
# Pallas kernels
# ----------------------------------------------------------------------------
def _convT_ln_lrelu_kernel(a_ref, w_ref, bias_ref, gamma_ref, beta_ref, o_ref):
    """Layers 1-3: transposed conv-matmul + LayerNorm([C,H,W]) + LeakyReLU(0.2).

    One grid step handles a block of B_blk samples via an in-kernel loop (the
    per-sample MXU work is tiny; what matters is that the epilogue and the
    stores are lane-dense: last dim = Ho*Wo).

    a_ref     : (B_blk, K, M) bf16   transposed im2col patches, K=(ky,kx,ci), M=(ho,wo)
    w_ref     : (N, K)        bf16   conv weight, rows = output channels
    bias_ref  : (N, 1)        f32    conv bias
    gamma_ref : (N, M)        f32    LayerNorm weight, native (C, H*W) layout
    beta_ref  : (N, M)        f32    LayerNorm bias
    o_ref     : (B_blk, N, M) bf16   LeakyReLU(LN(conv(x)))  (NCHW layout)
    """
    w = w_ref[...]
    bias = bias_ref[...]
    gamma = gamma_ref[...]
    beta = beta_ref[...]

    def body(s, carry):
        acc = jnp.dot(w, a_ref[s], preferred_element_type=jnp.float32)  # (N, M)
        acc = acc + bias                                  # conv bias (pre-LN!)
        # Per-sample LayerNorm over the whole (C, H, W) slice.
        mean = jnp.mean(acc, keepdims=True)
        xc = acc - mean
        var = jnp.mean(xc * xc, keepdims=True)
        y = xc * lax.rsqrt(var + 1e-5)
        y = y * gamma + beta
        o_ref[s] = jnp.maximum(y, 0.2 * y).astype(o_ref.dtype)   # LeakyReLU(0.2)
        return carry

    lax.fori_loop(0, a_ref.shape[0], body, 0)


def _conv4_head_kernel(a_ref, w_ref, bias_ref, gamma_ref, beta_ref,
                       w5_ref, b5_ref, o_ref):
    """Layer 4 + output head, fused.  All samples of the block are batched into
    the matmul M dimension; the (4,4,ndf*8) layer-4 activation never leaves
    VMEM and the final Conv2d(ndf*8 -> 1, k=4, valid) collapses to a
    per-sample dot with w5.

    a_ref     : (B_blk*16, K) bf16   im2col patches (16 = 4*4 output positions)
    w_ref     : (K, N)        bf16   layer-4 conv weight (N = ndf*8)
    bias_ref  : (1, N)        f32
    gamma_ref : (16, N)       f32    LayerNorm weight re-laid-out as (H*W, C)
    beta_ref  : (16, N)       f32
    w5_ref    : (16, N)       f32    output conv weight re-laid-out as (H*W, C)
    b5_ref    : (1,)          f32    output conv bias (SMEM scalar)
    o_ref     : (B_blk, 1, 1) f32    critic score per sample
    """
    bblk = o_ref.shape[0]
    n = w_ref.shape[1]
    acc = jnp.dot(a_ref[...], w_ref[...], preferred_element_type=jnp.float32)
    acc = acc + bias_ref[...]                             # (B_blk*16, N)
    x3 = acc.reshape(bblk, 16, n)                         # per-sample slabs
    mean = jnp.mean(x3, axis=(1, 2), keepdims=True)       # per-sample LN stats
    xc = x3 - mean
    var = jnp.mean(xc * xc, axis=(1, 2), keepdims=True)
    y = xc * lax.rsqrt(var + 1e-5)
    y = y * gamma_ref[...] + beta_ref[...]
    y = jnp.maximum(y, 0.2 * y)                           # LeakyReLU(0.2)
    # fused output conv: one scalar per sample
    s = jnp.sum(y * w5_ref[...], axis=(1, 2), keepdims=True)   # (B_blk, 1, 1)
    o_ref[...] = s + b5_ref[0]


# ----------------------------------------------------------------------------
# Pallas wrappers
# ----------------------------------------------------------------------------
def _pick_blocks(batch, per_sample_bytes, target_block_bytes=8 << 20):
    """Number of grid blocks: >= 2 when possible (v7x dual TensorCore) and a
    divisor of `batch` small enough that blocks stay well inside VMEM."""
    min_blocks = 2 if batch >= 2 else 1
    need = max(min_blocks,
               (batch * per_sample_bytes + target_block_bytes - 1)
               // target_block_bytes)
    for d in range(int(need), batch + 1):
        if batch % d == 0:
            return d
    return batch


def conv_t_ln_lrelu(aT, wT, bias_col, gammaT, betaT, *, nblk):
    """aT: (B, K, M) bf16 -> (B, N, M) bf16 (fused conv + LN + LeakyReLU)."""
    B, K, M = aT.shape
    N = wT.shape[0]
    bblk = B // nblk
    return pl.pallas_call(
        _convT_ln_lrelu_kernel,
        out_shape=jax.ShapeDtypeStruct((B, N, M), jnp.bfloat16),
        grid=(nblk,),
        in_specs=[
            pl.BlockSpec((bblk, K, M), lambda b: (b, 0, 0)),
            pl.BlockSpec((N, K), lambda b: (0, 0)),
            pl.BlockSpec((N, 1), lambda b: (0, 0)),
            pl.BlockSpec((N, M), lambda b: (0, 0)),
            pl.BlockSpec((N, M), lambda b: (0, 0)),
        ],
        out_specs=pl.BlockSpec((bblk, N, M), lambda b: (b, 0, 0)),
        compiler_params=pltpu.CompilerParams(
            dimension_semantics=("parallel",)),   # >= 2 blocks -> both v7x TCs busy
    )(aT, wT, bias_col, gammaT, betaT)


def conv4_head(a4, w4m, bias4, gamma4, beta4, w5m, b5, *, nblk):
    """a4: (B*16, K) bf16 -> (B, 1) f32 (layer 4 + output conv, fused)."""
    BM, K = a4.shape
    B = BM // 16
    N = w4m.shape[1]
    bblk = B // nblk
    out = pl.pallas_call(
        _conv4_head_kernel,
        out_shape=jax.ShapeDtypeStruct((B, 1, 1), jnp.float32),
        grid=(nblk,),
        in_specs=[
            pl.BlockSpec((bblk * 16, K), lambda b: (b, 0)),
            pl.BlockSpec((K, N), lambda b: (0, 0)),
            pl.BlockSpec((1, N), lambda b: (0, 0)),
            pl.BlockSpec((16, N), lambda b: (0, 0)),
            pl.BlockSpec((16, N), lambda b: (0, 0)),
            pl.BlockSpec((16, N), lambda b: (0, 0)),
            pl.BlockSpec(memory_space=pltpu.MemorySpace.SMEM),
        ],
        out_specs=pl.BlockSpec((bblk, 1, 1), lambda b: (b, 0, 0)),
        compiler_params=pltpu.CompilerParams(
            dimension_semantics=("parallel",)),
    )(a4, w4m, bias4, gamma4, beta4, w5m, b5)
    return out.reshape(B, 1)


# ----------------------------------------------------------------------------
# Conv2d lowering glue (im2col for stride-2, pad-1, 4x4 convs; NCHW input)
# ----------------------------------------------------------------------------
def _im2col_nchw_T(x, ksize=4, stride=2, pad=1):
    """x: (B, C, H, W) -> (B, K, M) with K order (ky, kx, ci), M = (ho, wo)."""
    B, C, H, W = x.shape
    Ho = (H + 2 * pad - ksize) // stride + 1
    Wo = (W + 2 * pad - ksize) // stride + 1
    xp = jnp.pad(x, ((0, 0), (0, 0), (pad, pad), (pad, pad)))
    taps = [xp[:, :, ky:ky + stride * Ho:stride, kx:kx + stride * Wo:stride]
            for ky in range(ksize) for kx in range(ksize)]
    a = jnp.stack(taps, axis=1)                           # (B, k*k, C, Ho, Wo)
    return a.reshape(B, ksize * ksize * C, Ho * Wo), (Ho, Wo)


def _im2col_nchw(x, ksize=4, stride=2, pad=1):
    """x: (B, C, H, W) -> (B, M, K) with M = (ho, wo), K order (ky, kx, ci)."""
    B, C, H, W = x.shape
    Ho = (H + 2 * pad - ksize) // stride + 1
    Wo = (W + 2 * pad - ksize) // stride + 1
    xp = jnp.pad(x, ((0, 0), (0, 0), (pad, pad), (pad, pad)))
    taps = [xp[:, :, ky:ky + stride * Ho:stride, kx:kx + stride * Wo:stride]
            for ky in range(ksize) for kx in range(ksize)]
    a = jnp.stack(taps, axis=1)                           # (B, k*k, C, Ho, Wo)
    a = a.transpose(0, 3, 4, 1, 2)                        # (B, Ho, Wo, k*k, C)
    return a.reshape(B, Ho * Wo, ksize * ksize * C), (Ho, Wo)


# ----------------------------------------------------------------------------
# Critic parameters, one-time re-layout, and forward
# ----------------------------------------------------------------------------
def init_params(key, ndf=16, nc=3):
    """Fresh-module defaults: Conv2d uniform(+-1/sqrt(fan_in)), LN gamma=1/beta=0."""
    def conv_init(k, cout, cin, ksz):
        kw, kb = jax.random.split(k)
        fan_in = cin * ksz * ksz
        bound = 1.0 / (fan_in ** 0.5)
        w = jax.random.uniform(kw, (cout, cin, ksz, ksz), jnp.float32, -bound, bound)
        b = jax.random.uniform(kb, (cout,), jnp.float32, -bound, bound)
        return w, b

    ks = jax.random.split(key, 5)
    params = {}
    chans = [(nc, ndf), (ndf, ndf * 2), (ndf * 2, ndf * 4), (ndf * 4, ndf * 8)]
    spatial = [32, 16, 8, 4]            # LayerNorm([C, s, s]) shapes from the module
    for i, (cin, cout) in enumerate(chans):
        w, b = conv_init(ks[i], cout, cin, 4)
        s = spatial[i]
        params[f"w{i+1}"] = w
        params[f"b{i+1}"] = b
        params[f"ln{i+1}_g"] = jnp.ones((cout, s, s), jnp.float32)
        params[f"ln{i+1}_b"] = jnp.zeros((cout, s, s), jnp.float32)
    w5, b5 = conv_init(ks[4], 1, ndf * 8, 4)
    params["w5"], params["b5"] = w5, b5
    return params


def prepare_params(params):
    """One-time weight/LN re-layouts + bf16 casts (kept out of the jitted forward)."""
    prep = {}
    for i in (1, 2, 3):
        w = params[f"w{i}"]                                # (Cout, Cin, 4, 4)
        cout = w.shape[0]
        prep[f"wT{i}"] = jnp.asarray(
            w.transpose(0, 2, 3, 1).reshape(cout, -1), jnp.bfloat16)   # (N, K)
        prep[f"b{i}"] = jnp.asarray(params[f"b{i}"].reshape(cout, 1), jnp.float32)
        prep[f"g{i}"] = jnp.asarray(params[f"ln{i}_g"].reshape(cout, -1), jnp.float32)
        prep[f"be{i}"] = jnp.asarray(params[f"ln{i}_b"].reshape(cout, -1), jnp.float32)
    w4 = params["w4"]
    cout4 = w4.shape[0]
    prep["w4m"] = jnp.asarray(
        w4.transpose(2, 3, 1, 0).reshape(-1, cout4), jnp.bfloat16)     # (K, N)
    prep["b4"] = jnp.asarray(params["b4"].reshape(1, cout4), jnp.float32)
    prep["g4"] = jnp.asarray(
        params["ln4_g"].transpose(1, 2, 0).reshape(-1, cout4), jnp.float32)
    prep["be4"] = jnp.asarray(
        params["ln4_b"].transpose(1, 2, 0).reshape(-1, cout4), jnp.float32)
    prep["w5m"] = jnp.asarray(
        params["w5"][0].transpose(1, 2, 0).reshape(-1, cout4), jnp.float32)
    prep["b5"] = jnp.asarray(params["b5"], jnp.float32)                # (1,)
    return prep


@jax.jit
def critic_forward(prep, x_nchw):
    """x: (B, nc, 64, 64) float32 -> (B, 1, 1, 1) float32."""
    B = x_nchw.shape[0]
    h = x_nchw.astype(jnp.bfloat16)                        # NCHW through layers 1-3

    for i in (1, 2, 3):                                    # conv s2 + LN + LeakyReLU
        aT, (Ho, Wo) = _im2col_nchw_T(h)
        _, K, M = aT.shape
        N = prep[f"wT{i}"].shape[0]
        nblk = _pick_blocks(B, per_sample_bytes=2 * (K + N) * M)
        out = conv_t_ln_lrelu(aT, prep[f"wT{i}"], prep[f"b{i}"],
                              prep[f"g{i}"], prep[f"be{i}"], nblk=nblk)
        h = out.reshape(B, N, Ho, Wo)

    # layer 4 + output head (fused): all samples batched into the matmul M dim
    a4, _ = _im2col_nchw(h)                                # (B, 16, K4)
    K4 = a4.shape[-1]
    a4 = a4.reshape(B * 16, K4)
    nblk = _pick_blocks(B, per_sample_bytes=2 * 16 * K4)
    out = conv4_head(a4, prep["w4m"], prep["b4"], prep["g4"], prep["be4"],
                     prep["w5m"], prep["b5"], nblk=nblk)   # (B, 1)
    return out.reshape(B, 1, 1, 1)                         # NCHW, matches PyTorch


# ----------------------------------------------------------------------------
if __name__ == "__main__":
    key = jax.random.PRNGKey(0)
    k_param, k_x = jax.random.split(key)

    # Spatial size is pinned to 64x64 by the module's hard-coded LayerNorm shapes;
    # keep ndf/nc/B small.
    ndf, nc, B = 16, 3, 2
    params = init_params(k_param, ndf=ndf, nc=nc)
    prep = prepare_params(params)                          # one-time re-layout

    x = jax.random.normal(k_x, (B, nc, 64, 64), jnp.float32)

    out = critic_forward(prep, x)
    out = jax.block_until_ready(out)

    assert out.shape == (B, 1, 1, 1), out.shape
    assert bool(jnp.all(jnp.isfinite(out)))
    print("KERNEL_OK")
</pallas_src>

<mosaic_0001>
module attributes {stable_mosaic.version = 11 : i64} {
  func.func @_convT_ln_lrelu_kernel(%arg0: i32, %arg1: memref<1x48x1024xbf16, #tpu.memory_space<vmem>>, %arg2: memref<16x48xbf16, #tpu.memory_space<vmem>>, %arg3: memref<16x1xf32, #tpu.memory_space<vmem>>, %arg4: memref<16x1024xf32, #tpu.memory_space<vmem>>, %arg5: memref<16x1024xf32, #tpu.memory_space<vmem>>, %arg6: memref<1x16x1024xbf16, #tpu.memory_space<vmem>>) attributes {dimension_semantics = [#tpu.dimension_semantics<parallel>], iteration_bounds = array<i64: 2>, scalar_prefetch = 0 : i64, scratch_operands = 0 : i64, tpu.core_type = #tpu.core_type<tc>, window_params = [{transform_indices = @transform_0, window_bounds = array<i64: 1, 48, 1024>}, {pipeline_mode = #tpu.pipeline_mode<synchronous>, transform_indices = @transform_1, window_bounds = array<i64: 16, 48>}, {pipeline_mode = #tpu.pipeline_mode<synchronous>, transform_indices = @transform_2, window_bounds = array<i64: 16, 1>}, {pipeline_mode = #tpu.pipeline_mode<synchronous>, transform_indices = @transform_3, window_bounds = array<i64: 16, 1024>}, {pipeline_mode = #tpu.pipeline_mode<synchronous>, transform_indices = @transform_4, window_bounds = array<i64: 16, 1024>}, {transform_indices = @transform_5, window_bounds = array<i64: 1, 16, 1024>}]} {
    %c0 = arith.constant 0 : index
    %c0_0 = arith.constant 0 : index
    %0 = vector.load %arg2[%c0, %c0_0] : memref<16x48xbf16, #tpu.memory_space<vmem>>, vector<16x48xbf16>
    %c0_1 = arith.constant 0 : index
    %c0_2 = arith.constant 0 : index
    %1 = vector.load %arg3[%c0_1, %c0_2] : memref<16x1xf32, #tpu.memory_space<vmem>>, vector<16x1xf32>
    %c0_3 = arith.constant 0 : index
    %c0_4 = arith.constant 0 : index
    %2 = vector.load %arg4[%c0_3, %c0_4] : memref<16x1024xf32, #tpu.memory_space<vmem>>, vector<16x1024xf32>
    %c0_5 = arith.constant 0 : index
    %c0_6 = arith.constant 0 : index
    %3 = vector.load %arg5[%c0_5, %c0_6] : memref<16x1024xf32, #tpu.memory_space<vmem>>, vector<16x1024xf32>
    %c0_i32 = arith.constant 0 : i32
    %4 = arith.index_cast %c0_i32 : i32 to index
    %c0_7 = arith.constant 0 : index
    %c0_8 = arith.constant 0 : index
    %5 = vector.load %arg1[%4, %c0_7, %c0_8] : memref<1x48x1024xbf16, #tpu.memory_space<vmem>>, vector<1x48x1024xbf16>
    %6 = vector.shape_cast %5 : vector<1x48x1024xbf16> to vector<48x1024xbf16>
    %cst = arith.constant dense<0.000000e+00> : vector<16x1024xf32>
    %7 = tpu.matmul %0, %6, %cst {dimension_numbers = #tpu.dot_dimension_numbers<[1], [0], [0], [1], [0, 0, 1, 1], [], []>} : vector<16x48xbf16>, vector<48x1024xbf16>, vector<16x1024xf32> -> vector<16x1024xf32>
    %8 = vector.broadcast %1 : vector<16x1xf32> to vector<16x1024xf32>
    %9 = arith.addf %7, %8 : vector<16x1024xf32>
    %10 = vector.shape_cast %9 : vector<16x1024xf32> to vector<1x16x1024xf32>
    %cst_9 = arith.constant dense<0.000000e+00> : vector<1xf32>
    %11 = vector.multi_reduction <add>, %10, %cst_9 [1, 2] : vector<1x16x1024xf32> to vector<1xf32>
    %12 = vector.shape_cast %11 : vector<1xf32> to vector<1x1x1xf32>
    %13 = vector.extract %12[0, 0, 0] : f32 from vector<1x1x1xf32>
    %14 = vector.broadcast %13 : f32 to vector<1x1xf32>
    %cst_10 = arith.constant 1.638400e+04 : f32
    %15 = vector.broadcast %cst_10 : f32 to vector<1x1xf32>
    %16 = arith.divf %14, %15 : vector<1x1xf32>
    %17 = vector.broadcast %16 : vector<1x1xf32> to vector<16x1024xf32>
    %18 = arith.subf %9, %17 : vector<16x1024xf32>
    %19 = arith.mulf %18, %18 : vector<16x1024xf32>
    %20 = vector.shape_cast %19 : vector<16x1024xf32> to vector<1x16x1024xf32>
    %cst_11 = arith.constant dense<0.000000e+00> : vector<1xf32>
    %21 = vector.multi_reduction <add>, %20, %cst_11 [1, 2] : vector<1x16x1024xf32> to vector<1xf32>
    %22 = vector.shape_cast %21 : vector<1xf32> to vector<1x1x1xf32>
    %23 = vector.extract %22[0, 0, 0] : f32 from vector<1x1x1xf32>
    %24 = vector.broadcast %23 : f32 to vector<1x1xf32>
    %cst_12 = arith.constant 1.638400e+04 : f32
    %25 = vector.broadcast %cst_12 : f32 to vector<1x1xf32>
    %26 = arith.divf %24, %25 : vector<1x1xf32>
    %cst_13 = arith.constant 9.99999974E-6 : f32
    %27 = vector.broadcast %cst_13 : f32 to vector<1x1xf32>
    %28 = arith.addf %26, %27 : vector<1x1xf32>
    %29 = math.rsqrt %28 : vector<1x1xf32>
    %30 = vector.broadcast %29 : vector<1x1xf32> to vector<16x1024xf32>
    %31 = arith.mulf %18, %30 : vector<16x1024xf32>
    %32 = arith.mulf %31, %2 : vector<16x1024xf32>
    %33 = arith.addf %32, %3 : vector<16x1024xf32>
    %cst_14 = arith.constant 2.000000e-01 : f32
    %34 = vector.broadcast %cst_14 : f32 to vector<16x1024xf32>
    %35 = arith.mulf %34, %33 : vector<16x1024xf32>
    %36 = arith.maximumf %33, %35 : vector<16x1024xf32>
    %37 = arith.truncf %36 : vector<16x1024xf32> to vector<16x1024xbf16>
    %38 = arith.index_cast %c0_i32 : i32 to index
    %c0_15 = arith.constant 0 : index
    %c0_16 = arith.constant 0 : index
    %39 = vector.load %arg6[%38, %c0_15, %c0_16] : memref<1x16x1024xbf16, #tpu.memory_space<vmem>>, vector<1x16x1024xbf16>
    %40 = vector.shape_cast %39 : vector<1x16x1024xbf16> to vector<16x1024xbf16>
    %41 = vector.shape_cast %37 : vector<16x1024xbf16> to vector<1x16x1024xbf16>
    tpu.vector_store %arg6[%38, %c0_15, %c0_16], %41 {strides = array<i32>} : memref<1x16x1024xbf16, #tpu.memory_space<vmem>>, vector<1x16x1024xbf16>,
    %c1_i32 = arith.constant 1 : i32
    return
  }
  func.func @transform_0(%arg0: i32) -> (i32, i32, i32) {
    %c0_i32 = arith.constant 0 : i32
    %c0_i32_0 = arith.constant 0 : i32
    %c0_i32_1 = arith.constant 0 : i32
    return %arg0, %c0_i32, %c0_i32_0 : i32, i32, i32
  }
  func.func @transform_1(%arg0: i32) -> (i32, i32) {
    %c0_i32 = arith.constant 0 : i32
    %c0_i32_0 = arith.constant 0 : i32
    %c0_i32_1 = arith.constant 0 : i32
    return %c0_i32, %c0_i32_0 : i32, i32
  }
  func.func @transform_2(%arg0: i32) -> (i32, i32) {
    %c0_i32 = arith.constant 0 : i32
    %c0_i32_0 = arith.constant 0 : i32
    %c0_i32_1 = arith.constant 0 : i32
    return %c0_i32, %c0_i32_0 : i32, i32
  }
  func.func @transform_3(%arg0: i32) -> (i32, i32) {
    %c0_i32 = arith.constant 0 : i32
    %c0_i32_0 = arith.constant 0 : i32
    %c0_i32_1 = arith.constant 0 : i32
    return %c0_i32, %c0_i32_0 : i32, i32
  }
  func.func @transform_4(%arg0: i32) -> (i32, i32) {
    %c0_i32 = arith.constant 0 : i32
    %c0_i32_0 = arith.constant 0 : i32
    %c0_i32_1 = arith.constant 0 : i32
    return %c0_i32, %c0_i32_0 : i32, i32
  }
  func.func @transform_5(%arg0: i32) -> (i32, i32, i32) {
    %c0_i32 = arith.constant 0 : i32
    %c0_i32_0 = arith.constant 0 : i32
    %c0_i32_1 = arith.constant 0 : i32
    return %arg0, %c0_i32, %c0_i32_0 : i32, i32, i32
  }
}

module attributes {stable_mosaic.version = 11 : i64} {
  func.func @_convT_ln_lrelu_kernel(%arg0: i32, %arg1: memref<1x256x256xbf16, #tpu.memory_space<vmem>>, %arg2: memref<32x256xbf16, #tpu.memory_space<vmem>>, %arg3: memref<32x1xf32, #tpu.memory_space<vmem>>, %arg4: memref<32x256xf32, #tpu.memory_space<vmem>>, %arg5: memref<32x256xf32, #tpu.memory_space<vmem>>, %arg6: memref<1x32x256xbf16, #tpu.memory_space<vmem>>) attributes {dimension_semantics = [#tpu.dimension_semantics<parallel>], iteration_bounds = array<i64: 2>, scalar_prefetch = 0 : i64, scratch_operands = 0 : i64, tpu.core_type = #tpu.core_type<tc>, window_params = [{transform_indices = @transform_0, window_bounds = array<i64: 1, 256, 256>}, {pipeline_mode = #tpu.pipeline_mode<synchronous>, transform_indices = @transform_1, window_bounds = array<i64: 32, 256>}, {pipeline_mode = #tpu.pipeline_mode<synchronous>, transform_indices = @transform_2, window_bounds = array<i64: 32, 1>}, {pipeline_mode = #tpu.pipeline_mode<synchronous>, transform_indices = @transform_3, window_bounds = array<i64: 32, 256>}, {pipeline_mode = #tpu.pipeline_mode<synchronous>, transform_indices = @transform_4, window_bounds = array<i64: 32, 256>}, {transform_indices = @transform_5, window_bounds = array<i64: 1, 32, 256>}]} {
    %c0 = arith.constant 0 : index
    %c0_0 = arith.constant 0 : index
    %0 = vector.load %arg2[%c0, %c0_0] : memref<32x256xbf16, #tpu.memory_space<vmem>>, vector<32x256xbf16>
    %c0_1 = arith.constant 0 : index
    %c0_2 = arith.constant 0 : index
    %1 = vector.load %arg3[%c0_1, %c0_2] : memref<32x1xf32, #tpu.memory_space<vmem>>, vector<32x1xf32>
    %c0_3 = arith.constant 0 : index
    %c0_4 = arith.constant 0 : index
    %2 = vector.load %arg4[%c0_3, %c0_4] : memref<32x256xf32, #tpu.memory_space<vmem>>, vector<32x256xf32>
    %c0_5 = arith.constant 0 : index
    %c0_6 = arith.constant 0 : index
    %3 = vector.load %arg5[%c0_5, %c0_6] : memref<32x256xf32, #tpu.memory_space<vmem>>, vector<32x256xf32>
    %c0_i32 = arith.constant 0 : i32
    %4 = arith.index_cast %c0_i32 : i32 to index
    %c0_7 = arith.constant 0 : index
    %c0_8 = arith.constant 0 : index
    %5 = vector.load %arg1[%4, %c0_7, %c0_8] : memref<1x256x256xbf16, #tpu.memory_space<vmem>>, vector<1x256x256xbf16>
    %6 = vector.shape_cast %5 : vector<1x256x256xbf16> to vector<256x256xbf16>
    %cst = arith.constant dense<0.000000e+00> : vector<32x256xf32>
    %7 = tpu.matmul %0, %6, %cst {dimension_numbers = #tpu.dot_dimension_numbers<[1], [0], [0], [1], [0, 0, 1, 1], [], []>} : vector<32x256xbf16>, vector<256x256xbf16>, vector<32x256xf32> -> vector<32x256xf32>
    %8 = vector.broadcast %1 : vector<32x1xf32> to vector<32x256xf32>
    %9 = arith.addf %7, %8 : vector<32x256xf32>
    %10 = vector.shape_cast %9 : vector<32x256xf32> to vector<1x32x256xf32>
    %cst_9 = arith.constant dense<0.000000e+00> : vector<1xf32>
    %11 = vector.multi_reduction <add>, %10, %cst_9 [1, 2] : vector<1x32x256xf32> to vector<1xf32>
    %12 = vector.shape_cast %11 : vector<1xf32> to vector<1x1x1xf32>
    %13 = vector.extract %12[0, 0, 0] : f32 from vector<1x1x1xf32>
    %14 = vector.broadcast %13 : f32 to vector<1x1xf32>
    %cst_10 = arith.constant 8.192000e+03 : f32
    %15 = vector.broadcast %cst_10 : f32 to vector<1x1xf32>
    %16 = arith.divf %14, %15 : vector<1x1xf32>
    %17 = vector.broadcast %16 : vector<1x1xf32> to vector<32x256xf32>
    %18 = arith.subf %9, %17 : vector<32x256xf32>
    %19 = arith.mulf %18, %18 : vector<32x256xf32>
    %20 = vector.shape_cast %19 : vector<32x256xf32> to vector<1x32x256xf32>
    %cst_11 = arith.constant dense<0.000000e+00> : vector<1xf32>
    %21 = vector.multi_reduction <add>, %20, %cst_11 [1, 2] : vector<1x32x256xf32> to vector<1xf32>
    %22 = vector.shape_cast %21 : vector<1xf32> to vector<1x1x1xf32>
    %23 = vector.extract %22[0, 0, 0] : f32 from vector<1x1x1xf32>
    %24 = vector.broadcast %23 : f32 to vector<1x1xf32>
    %cst_12 = arith.constant 8.192000e+03 : f32
    %25 = vector.broadcast %cst_12 : f32 to vector<1x1xf32>
    %26 = arith.divf %24, %25 : vector<1x1xf32>
    %cst_13 = arith.constant 9.99999974E-6 : f32
    %27 = vector.broadcast %cst_13 : f32 to vector<1x1xf32>
    %28 = arith.addf %26, %27 : vector<1x1xf32>
    %29 = math.rsqrt %28 : vector<1x1xf32>
    %30 = vector.broadcast %29 : vector<1x1xf32> to vector<32x256xf32>
    %31 = arith.mulf %18, %30 : vector<32x256xf32>
    %32 = arith.mulf %31, %2 : vector<32x256xf32>
    %33 = arith.addf %32, %3 : vector<32x256xf32>
    %cst_14 = arith.constant 2.000000e-01 : f32
    %34 = vector.broadcast %cst_14 : f32 to vector<32x256xf32>
    %35 = arith.mulf %34, %33 : vector<32x256xf32>
    %36 = arith.maximumf %33, %35 : vector<32x256xf32>
    %37 = arith.truncf %36 : vector<32x256xf32> to vector<32x256xbf16>
    %38 = arith.index_cast %c0_i32 : i32 to index
    %c0_15 = arith.constant 0 : index
    %c0_16 = arith.constant 0 : index
    %39 = vector.load %arg6[%38, %c0_15, %c0_16] : memref<1x32x256xbf16, #tpu.memory_space<vmem>>, vector<1x32x256xbf16>
    %40 = vector.shape_cast %39 : vector<1x32x256xbf16> to vector<32x256xbf16>
    %41 = vector.shape_cast %37 : vector<32x256xbf16> to vector<1x32x256xbf16>
    tpu.vector_store %arg6[%38, %c0_15, %c0_16], %41 {strides = array<i32>} : memref<1x32x256xbf16, #tpu.memory_space<vmem>>, vector<1x32x256xbf16>,
    %c1_i32 = arith.constant 1 : i32
    return
  }
  func.func @transform_0(%arg0: i32) -> (i32, i32, i32) {
    %c0_i32 = arith.constant 0 : i32
    %c0_i32_0 = arith.constant 0 : i32
    %c0_i32_1 = arith.constant 0 : i32
    return %arg0, %c0_i32, %c0_i32_0 : i32, i32, i32
  }
  func.func @transform_1(%arg0: i32) -> (i32, i32) {
    %c0_i32 = arith.constant 0 : i32
    %c0_i32_0 = arith.constant 0 : i32
    %c0_i32_1 = arith.constant 0 : i32
    return %c0_i32, %c0_i32_0 : i32, i32
  }
  func.func @transform_2(%arg0: i32) -> (i32, i32) {
    %c0_i32 = arith.constant 0 : i32
    %c0_i32_0 = arith.constant 0 : i32
    %c0_i32_1 = arith.constant 0 : i32
    return %c0_i32, %c0_i32_0 : i32, i32
  }
  func.func @transform_3(%arg0: i32) -> (i32, i32) {
    %c0_i32 = arith.constant 0 : i32
    %c0_i32_0 = arith.constant 0 : i32
    %c0_i32_1 = arith.constant 0 : i32
    return %c0_i32, %c0_i32_0 : i32, i32
  }
  func.func @transform_4(%arg0: i32) -> (i32, i32) {
    %c0_i32 = arith.constant 0 : i32
    %c0_i32_0 = arith.constant 0 : i32
    %c0_i32_1 = arith.constant 0 : i32
    return %c0_i32, %c0_i32_0 : i32, i32
  }
  func.func @transform_5(%arg0: i32) -> (i32, i32, i32) {
    %c0_i32 = arith.constant 0 : i32
    %c0_i32_0 = arith.constant 0 : i32
    %c0_i32_1 = arith.constant 0 : i32
    return %arg0, %c0_i32, %c0_i32_0 : i32, i32, i32
  }
}

module attributes {stable_mosaic.version = 11 : i64} {
  func.func @_convT_ln_lrelu_kernel(%arg0: i32, %arg1: memref<1x512x64xbf16, #tpu.memory_space<vmem>>, %arg2: memref<64x512xbf16, #tpu.memory_space<vmem>>, %arg3: memref<64x1xf32, #tpu.memory_space<vmem>>, %arg4: memref<64x64xf32, #tpu.memory_space<vmem>>, %arg5: memref<64x64xf32, #tpu.memory_space<vmem>>, %arg6: memref<1x64x64xbf16, #tpu.memory_space<vmem>>) attributes {dimension_semantics = [#tpu.dimension_semantics<parallel>], iteration_bounds = array<i64: 2>, scalar_prefetch = 0 : i64, scratch_operands = 0 : i64, tpu.core_type = #tpu.core_type<tc>, window_params = [{transform_indices = @transform_0, window_bounds = array<i64: 1, 512, 64>}, {pipeline_mode = #tpu.pipeline_mode<synchronous>, transform_indices = @transform_1, window_bounds = array<i64: 64, 512>}, {pipeline_mode = #tpu.pipeline_mode<synchronous>, transform_indices = @transform_2, window_bounds = array<i64: 64, 1>}, {pipeline_mode = #tpu.pipeline_mode<synchronous>, transform_indices = @transform_3, window_bounds = array<i64: 64, 64>}, {pipeline_mode = #tpu.pipeline_mode<synchronous>, transform_indices = @transform_4, window_bounds = array<i64: 64, 64>}, {transform_indices = @transform_5, window_bounds = array<i64: 1, 64, 64>}]} {
    %c0 = arith.constant 0 : index
    %c0_0 = arith.constant 0 : index
    %0 = vector.load %arg2[%c0, %c0_0] : memref<64x512xbf16, #tpu.memory_space<vmem>>, vector<64x512xbf16>
    %c0_1 = arith.constant 0 : index
    %c0_2 = arith.constant 0 : index
    %1 = vector.load %arg3[%c0_1, %c0_2] : memref<64x1xf32, #tpu.memory_space<vmem>>, vector<64x1xf32>
    %c0_3 = arith.constant 0 : index
    %c0_4 = arith.constant 0 : index
    %2 = vector.load %arg4[%c0_3, %c0_4] : memref<64x64xf32, #tpu.memory_space<vmem>>, vector<64x64xf32>
    %c0_5 = arith.constant 0 : index
    %c0_6 = arith.constant 0 : index
    %3 = vector.load %arg5[%c0_5, %c0_6] : memref<64x64xf32, #tpu.memory_space<vmem>>, vector<64x64xf32>
    %c0_i32 = arith.constant 0 : i32
    %4 = arith.index_cast %c0_i32 : i32 to index
    %c0_7 = arith.constant 0 : index
    %c0_8 = arith.constant 0 : index
    %5 = vector.load %arg1[%4, %c0_7, %c0_8] : memref<1x512x64xbf16, #tpu.memory_space<vmem>>, vector<1x512x64xbf16>
    %6 = vector.shape_cast %5 : vector<1x512x64xbf16> to vector<512x64xbf16>
    %cst = arith.constant dense<0.000000e+00> : vector<64x64xf32>
    %7 = tpu.matmul %0, %6, %cst {dimension_numbers = #tpu.dot_dimension_numbers<[1], [0], [0], [1], [0, 0, 1, 1], [], []>} : vector<64x512xbf16>, vector<512x64xbf16>, vector<64x64xf32> -> vector<64x64xf32>
    %8 = vector.broadcast %1 : vector<64x1xf32> to vector<64x64xf32>
    %9 = arith.addf %7, %8 : vector<64x64xf32>
    %10 = vector.shape_cast %9 : vector<64x64xf32> to vector<1x64x64xf32>
    %cst_9 = arith.constant dense<0.000000e+00> : vector<1xf32>
    %11 = vector.multi_reduction <add>, %10, %cst_9 [1, 2] : vector<1x64x64xf32> to vector<1xf32>
    %12 = vector.shape_cast %11 : vector<1xf32> to vector<1x1x1xf32>
    %13 = vector.extract %12[0, 0, 0] : f32 from vector<1x1x1xf32>
    %14 = vector.broadcast %13 : f32 to vector<1x1xf32>
    %cst_10 = arith.constant 4.096000e+03 : f32
    %15 = vector.broadcast %cst_10 : f32 to vector<1x1xf32>
    %16 = arith.divf %14, %15 : vector<1x1xf32>
    %17 = vector.broadcast %16 : vector<1x1xf32> to vector<64x64xf32>
    %18 = arith.subf %9, %17 : vector<64x64xf32>
    %19 = arith.mulf %18, %18 : vector<64x64xf32>
    %20 = vector.shape_cast %19 : vector<64x64xf32> to vector<1x64x64xf32>
    %cst_11 = arith.constant dense<0.000000e+00> : vector<1xf32>
    %21 = vector.multi_reduction <add>, %20, %cst_11 [1, 2] : vector<1x64x64xf32> to vector<1xf32>
    %22 = vector.shape_cast %21 : vector<1xf32> to vector<1x1x1xf32>
    %23 = vector.extract %22[0, 0, 0] : f32 from vector<1x1x1xf32>
    %24 = vector.broadcast %23 : f32 to vector<1x1xf32>
    %cst_12 = arith.constant 4.096000e+03 : f32
    %25 = vector.broadcast %cst_12 : f32 to vector<1x1xf32>
    %26 = arith.divf %24, %25 : vector<1x1xf32>
    %cst_13 = arith.constant 9.99999974E-6 : f32
    %27 = vector.broadcast %cst_13 : f32 to vector<1x1xf32>
    %28 = arith.addf %26, %27 : vector<1x1xf32>
    %29 = math.rsqrt %28 : vector<1x1xf32>
    %30 = vector.broadcast %29 : vector<1x1xf32> to vector<64x64xf32>
    %31 = arith.mulf %18, %30 : vector<64x64xf32>
    %32 = arith.mulf %31, %2 : vector<64x64xf32>
    %33 = arith.addf %32, %3 : vector<64x64xf32>
    %cst_14 = arith.constant 2.000000e-01 : f32
    %34 = vector.broadcast %cst_14 : f32 to vector<64x64xf32>
    %35 = arith.mulf %34, %33 : vector<64x64xf32>
    %36 = arith.maximumf %33, %35 : vector<64x64xf32>
    %37 = arith.truncf %36 : vector<64x64xf32> to vector<64x64xbf16>
    %38 = arith.index_cast %c0_i32 : i32 to index
    %c0_15 = arith.constant 0 : index
    %c0_16 = arith.constant 0 : index
    %39 = vector.load %arg6[%38, %c0_15, %c0_16] : memref<1x64x64xbf16, #tpu.memory_space<vmem>>, vector<1x64x64xbf16>
    %40 = vector.shape_cast %39 : vector<1x64x64xbf16> to vector<64x64xbf16>
    %41 = vector.shape_cast %37 : vector<64x64xbf16> to vector<1x64x64xbf16>
    tpu.vector_store %arg6[%38, %c0_15, %c0_16], %41 {strides = array<i32>} : memref<1x64x64xbf16, #tpu.memory_space<vmem>>, vector<1x64x64xbf16>,
    %c1_i32 = arith.constant 1 : i32
    return
  }
  func.func @transform_0(%arg0: i32) -> (i32, i32, i32) {
    %c0_i32 = arith.constant 0 : i32
    %c0_i32_0 = arith.constant 0 : i32
    %c0_i32_1 = arith.constant 0 : i32
    return %arg0, %c0_i32, %c0_i32_0 : i32, i32, i32
  }
  func.func @transform_1(%arg0: i32) -> (i32, i32) {
    %c0_i32 = arith.constant 0 : i32
    %c0_i32_0 = arith.constant 0 : i32
    %c0_i32_1 = arith.constant 0 : i32
    return %c0_i32, %c0_i32_0 : i32, i32
  }
  func.func @transform_2(%arg0: i32) -> (i32, i32) {
    %c0_i32 = arith.constant 0 : i32
    %c0_i32_0 = arith.constant 0 : i32
    %c0_i32_1 = arith.constant 0 : i32
    return %c0_i32, %c0_i32_0 : i32, i32
  }
  func.func @transform_3(%arg0: i32) -> (i32, i32) {
    %c0_i32 = arith.constant 0 : i32
    %c0_i32_0 = arith.constant 0 : i32
    %c0_i32_1 = arith.constant 0 : i32
    return %c0_i32, %c0_i32_0 : i32, i32
  }
  func.func @transform_4(%arg0: i32) -> (i32, i32) {
    %c0_i32 = arith.constant 0 : i32
    %c0_i32_0 = arith.constant 0 : i32
    %c0_i32_1 = arith.constant 0 : i32
    return %c0_i32, %c0_i32_0 : i32, i32
  }
  func.func @transform_5(%arg0: i32) -> (i32, i32, i32) {
    %c0_i32 = arith.constant 0 : i32
    %c0_i32_0 = arith.constant 0 : i32
    %c0_i32_1 = arith.constant 0 : i32
    return %arg0, %c0_i32, %c0_i32_0 : i32, i32, i32
  }
}

module attributes {stable_mosaic.version = 11 : i64} {
  func.func @_conv4_head_kernel(%arg0: i32, %arg1: memref<16x1024xbf16, #tpu.memory_space<vmem>>, %arg2: memref<1024x128xbf16, #tpu.memory_space<vmem>>, %arg3: memref<1x128xf32, #tpu.memory_space<vmem>>, %arg4: memref<16x128xf32, #tpu.memory_space<vmem>>, %arg5: memref<16x128xf32, #tpu.memory_space<vmem>>, %arg6: memref<16x128xf32, #tpu.memory_space<vmem>>, %arg7: memref<1xf32, #tpu.memory_space<smem>>, %arg8: memref<1x1x1xf32, #tpu.memory_space<vmem>>) attributes {dimension_semantics = [#tpu.dimension_semantics<parallel>], iteration_bounds = array<i64: 2>, scalar_prefetch = 0 : i64, scratch_operands = 0 : i64, tpu.core_type = #tpu.core_type<tc>, window_params = [{transform_indices = @transform_0, window_bounds = array<i64: 16, 1024>}, {pipeline_mode = #tpu.pipeline_mode<synchronous>, transform_indices = @transform_1, window_bounds = array<i64: 1024, 128>}, {pipeline_mode = #tpu.pipeline_mode<synchronous>, transform_indices = @transform_2, window_bounds = array<i64: 1, 128>}, {pipeline_mode = #tpu.pipeline_mode<synchronous>, transform_indices = @transform_3, window_bounds = array<i64: 16, 128>}, {pipeline_mode = #tpu.pipeline_mode<synchronous>, transform_indices = @transform_4, window_bounds = array<i64: 16, 128>}, {pipeline_mode = #tpu.pipeline_mode<synchronous>, transform_indices = @transform_5, window_bounds = array<i64: 16, 128>}, {transform_indices = @transform_6, window_bounds = array<i64: 1>}, {transform_indices = @transform_7, window_bounds = array<i64: 1, 1, 1>}]} {
    %c0 = arith.constant 0 : index
    %c0_0 = arith.constant 0 : index
    %0 = vector.load %arg1[%c0, %c0_0] : memref<16x1024xbf16, #tpu.memory_space<vmem>>, vector<16x1024xbf16>
    %c0_1 = arith.constant 0 : index
    %c0_2 = arith.constant 0 : index
    %1 = vector.load %arg2[%c0_1, %c0_2] : memref<1024x128xbf16, #tpu.memory_space<vmem>>, vector<1024x128xbf16>
    %cst = arith.constant dense<0.000000e+00> : vector<16x128xf32>
    %2 = tpu.matmul %0, %1, %cst {dimension_numbers = #tpu.dot_dimension_numbers<[1], [0], [0], [1], [0, 0, 1, 1], [], []>} : vector<16x1024xbf16>, vector<1024x128xbf16>, vector<16x128xf32> -> vector<16x128xf32>
    %c0_3 = arith.constant 0 : index
    %c0_4 = arith.constant 0 : index
    %3 = vector.load %arg3[%c0_3, %c0_4] : memref<1x128xf32, #tpu.memory_space<vmem>>, vector<1x128xf32>
    %4 = vector.broadcast %3 : vector<1x128xf32> to vector<16x128xf32>
    %5 = arith.addf %2, %4 : vector<16x128xf32>
    %6 = vector.shape_cast %5 : vector<16x128xf32> to vector<1x16x128xf32>
    %cst_5 = arith.constant dense<0.000000e+00> : vector<1xf32>
    %7 = vector.multi_reduction <add>, %6, %cst_5 [1, 2] : vector<1x16x128xf32> to vector<1xf32>
    %8 = vector.shape_cast %7 : vector<1xf32> to vector<1x1x1xf32>
    %cst_6 = arith.constant 2.048000e+03 : f32
    %9 = vector.broadcast %cst_6 : f32 to vector<1x1x1xf32>
    %10 = arith.divf %8, %9 : vector<1x1x1xf32>
    %11 = vector.broadcast %10 : vector<1x1x1xf32> to vector<1x16x128xf32>
    %12 = arith.subf %6, %11 : vector<1x16x128xf32>
    %13 = arith.mulf %12, %12 : vector<1x16x128xf32>
    %cst_7 = arith.constant dense<0.000000e+00> : vector<1xf32>
    %14 = vector.multi_reduction <add>, %13, %cst_7 [1, 2] : vector<1x16x128xf32> to vector<1xf32>
    %15 = vector.shape_cast %14 : vector<1xf32> to vector<1x1x1xf32>
    %cst_8 = arith.constant 2.048000e+03 : f32
    %16 = vector.broadcast %cst_8 : f32 to vector<1x1x1xf32>
    %17 = arith.divf %15, %16 : vector<1x1x1xf32>
    %cst_9 = arith.constant 9.99999974E-6 : f32
    %18 = vector.broadcast %cst_9 : f32 to vector<1x1x1xf32>
    %19 = arith.addf %17, %18 : vector<1x1x1xf32>
    %20 = math.rsqrt %19 : vector<1x1x1xf32>
    %21 = vector.broadcast %20 : vector<1x1x1xf32> to vector<1x16x128xf32>
    %22 = arith.mulf %12, %21 : vector<1x16x128xf32>
    %c0_10 = arith.constant 0 : index
    %c0_11 = arith.constant 0 : index
    %23 = vector.load %arg4[%c0_10, %c0_11] : memref<16x128xf32, #tpu.memory_space<vmem>>, vector<16x128xf32>
    %24 = vector.shape_cast %23 : vector<16x128xf32> to vector<1x16x128xf32>
    %25 = arith.mulf %22, %24 : vector<1x16x128xf32>
    %c0_12 = arith.constant 0 : index
    %c0_13 = arith.constant 0 : index
    %26 = vector.load %arg5[%c0_12, %c0_13] : memref<16x128xf32, #tpu.memory_space<vmem>>, vector<16x128xf32>
    %27 = vector.shape_cast %26 : vector<16x128xf32> to vector<1x16x128xf32>
    %28 = arith.addf %25, %27 : vector<1x16x128xf32>
    %cst_14 = arith.constant 2.000000e-01 : f32
    %29 = vector.broadcast %cst_14 : f32 to vector<1x16x128xf32>
    %30 = arith.mulf %29, %28 : vector<1x16x128xf32>
    %31 = arith.maximumf %28, %30 : vector<1x16x128xf32>
    %c0_15 = arith.constant 0 : index
    %c0_16 = arith.constant 0 : index
    %32 = vector.load %arg6[%c0_15, %c0_16] : memref<16x128xf32, #tpu.memory_space<vmem>>, vector<16x128xf32>
    %33 = vector.shape_cast %32 : vector<16x128xf32> to vector<1x16x128xf32>
    %34 = arith.mulf %31, %33 : vector<1x16x128xf32>
    %cst_17 = arith.constant dense<0.000000e+00> : vector<1xf32>
    %35 = vector.multi_reduction <add>, %34, %cst_17 [1, 2] : vector<1x16x128xf32> to vector<1xf32>
    %36 = vector.shape_cast %35 : vector<1xf32> to vector<1x1x1xf32>
    %c0_18 = arith.constant 0 : index
    %37 = memref.load %arg7[%c0_18] : memref<1xf32, #tpu.memory_space<smem>>
    %38 = vector.broadcast %37 : f32 to vector<1x1x1xf32>
    %39 = arith.addf %36, %38 : vector<1x1x1xf32>
    %c0_19 = arith.constant 0 : index
    %c0_20 = arith.constant 0 : index
    %c0_21 = arith.constant 0 : index
    %40 = vector.load %arg8[%c0_19, %c0_20, %c0_21] : memref<1x1x1xf32, #tpu.memory_space<vmem>>, vector<1x1x1xf32>
    tpu.vector_store %arg8[%c0_19, %c0_20, %c0_21], %39 {strides = array<i32>} : memref<1x1x1xf32, #tpu.memory_space<vmem>>, vector<1x1x1xf32>,
    return
  }
  func.func @transform_0(%arg0: i32) -> (i32, i32) {
    %c0_i32 = arith.constant 0 : i32
    %c0_i32_0 = arith.constant 0 : i32
    return %arg0, %c0_i32 : i32, i32
  }
  func.func @transform_1(%arg0: i32) -> (i32, i32) {
    %c0_i32 = arith.constant 0 : i32
    %c0_i32_0 = arith.constant 0 : i32
    %c0_i32_1 = arith.constant 0 : i32
    return %c0_i32, %c0_i32_0 : i32, i32
  }
  func.func @transform_2(%arg0: i32) -> (i32, i32) {
    %c0_i32 = arith.constant 0 : i32
    %c0_i32_0 = arith.constant 0 : i32
    %c0_i32_1 = arith.constant 0 : i32
    return %c0_i32, %c0_i32_0 : i32, i32
  }
  func.func @transform_3(%arg0: i32) -> (i32, i32) {
    %c0_i32 = arith.constant 0 : i32
    %c0_i32_0 = arith.constant 0 : i32
    %c0_i32_1 = arith.constant 0 : i32
    return %c0_i32, %c0_i32_0 : i32, i32
  }
  func.func @transform_4(%arg0: i32) -> (i32, i32) {
    %c0_i32 = arith.constant 0 : i32
    %c0_i32_0 = arith.constant 0 : i32
    %c0_i32_1 = arith.constant 0 : i32
    return %c0_i32, %c0_i32_0 : i32, i32
  }
  func.func @transform_5(%arg0: i32) -> (i32, i32) {
    %c0_i32 = arith.constant 0 : i32
    %c0_i32_0 = arith.constant 0 : i32
    %c0_i32_1 = arith.constant 0 : i32
    return %c0_i32, %c0_i32_0 : i32, i32
  }
  func.func @transform_6(%arg0: i32) -> i32 {
    %c0_i32 = arith.constant 0 : i32
    %c0_i32_0 = arith.constant 0 : i32
    return %c0_i32 : i32
  }
  func.func @transform_7(%arg0: i32) -> (i32, i32, i32) {
    %c0_i32 = arith.constant 0 : i32
    %c0_i32_0 = arith.constant 0 : i32
    %c0_i32_1 = arith.constant 0 : i32
    return %arg0, %c0_i32, %c0_i32_0 : i32, i32, i32
  }
}

</mosaic_0001>

<bundles_post_ra>
// kernel: critic_forward.4
= control target key start
LH: loop header
LB: loop body
LE: loop exit
PB: predicated region body
PF: predicated region fallthrough
CT: control target
= control target key end

     0   :  { %s988_s18 = smov 0   ;;  %s1201_s0 = inlined_call_operand.vmem [shape: bf16[2,48,1024], index: 0, kind: input, shape index: {}]   ;;  %s1202_s1 = inlined_call_operand.vmem [shape: bf16[16,48], index: 1, kind: input, shape index: {}]   ;;  %s1203_s2 = inlined_call_operand.vmem [shape: f32[16,1], index: 2, kind: input, shape index: {}]   ;;  %s1204_s3 = inlined_call_operand.vmem [shape: f32[16,1024], index: 3, kind: input, shape index: {}]   ;;  %s1205_s4 = inlined_call_operand.vmem [shape: f32[16,1024], index: 4, kind: input, shape index: {}]   ;;  %s1206_s5 = inlined_call_operand.vmem [shape: bf16[2,16,1024], index: 5, kind: output, shape index: {}]  }
   0x1 LB: > { %s875_s19 = sadd.s32 4294967295, %s955_s18   ;;  %p879_p0 = scmp.ge.s32.totalorder %s955_s18, 1  ;;  %s955_s18 = sphi %s988_s18, %s15_s18  }
   0x2   : > { %p187_p1 = scmp.lt.s32.totalorder %s955_s18, 3 }
   0x4   : > { %p188_p2 = pnand %p879_p0, %p187_p1 }
   0x5   : > { %p215_p3 = scmp.lt.s32.totalorder (!%p188_p2), %s875_s19, 1  ;;  %v957_v0 = vmov (!%p188_p2), 0   ;;  %v228_v1 = vld [vmem:[%s1203_s2] sm:$0xff] (!%p188_p2)  ;;  %v229_v2 = vld [vmem:[%s1203_s2 + $0x8] sm:$0xff] (!%p188_p2)  ;;  %vm421_vm0 = vcmask (!%p188_p2), 392192  }
   0x6   : > { %191 = sbr.rel (%p188_p2) target bundleno = 770 (0x302), region = 40  ;;  %457 = vmatprep.mubr.bf16.mxu0 (!%p188_p2), %v957_v0  ;;  %500 = vmatprep.mubr.bf16.mxu1 (!%p188_p2), %v957_v0  ;;  %v946_v35 = vld [vmem:[%s1202_s1] sm:$0xff] (!%p188_p2)  }
   0x7   : > { %945 = vset.pattern.permute.xlu0 (!%p188_p2), %v957_v0 }
   0x8   : > { %288 = vperm.xlu0 (!%p188_p2), %945, %v228_v1  }
   0xc   : > { %293 = vperm.xlu0 (!%p188_p2), %945, %v229_v2  }
   0xd   : > { %s1208_s19 = smov (!%p215_p3, %s875_s19), 1 }
   0xe   : > { %s931_s22 = smul.u32 192, %s1208_s19 }
  0x10   : > { %s1011_s27 = scalar_lea.vmem %s1201_s0, %s931_s22 }
  0x11   : > { %v262_v3 = vld [vmem:[%s1011_s27] sm:$0xff]  ;;  %v263_v5 = vld [vmem:[%s1011_s27 + $0x8] sm:$0xff]  ;;  %v264_v25 = vld [vmem:[%s1011_s27 + $0x10] sm:$0xff] }
  0x12   : > { %v266_v4 = vld [vmem:[%s1011_s27 + $0x20] sm:$0xff]  ;;  %v267_v7 = vld [vmem:[%s1011_s27 + $0x28] sm:$0xff]  ;;  %v268_v26 = vld [vmem:[%s1011_s27 + $0x30] sm:$0xff] }
  0x13   : > { %v885_v6 = vcombine.high %v262_v3, %v266_v4  ;;  %v884_v8 = vcombine.low %v262_v3, %v266_v4  ;;  %v270_v9 = vld [vmem:[%s1011_s27 + $0x40] sm:$0xff]  ;;  %v887_v11 = vcombine.high %v263_v5, %v267_v7  ;;  %v886_v12 = vcombine.low %v263_v5, %v267_v7  ;;  %v271_v14 = vld [vmem:[%s1011_s27 + $0x48] sm:$0xff]  ;;  %v265_v27 = vld [vmem:[%s1011_s27 + $0x18] sm:$0xff] }
  0x14   : > { %v274_v10 = vld [vmem:[%s1011_s27 + $0x60] sm:$0xff]  ;;  %v275_v15 = vld [vmem:[%s1011_s27 + $0x68] sm:$0xff]  ;;  %v269_v28 = vld [vmem:[%s1011_s27 + $0x38] sm:$0xff]  ;;  %v889_v31 = vcombine.high %v264_v25, %v268_v26  ;;  %v888_v38 = vcombine.low %v264_v25, %v268_v26 }
  0x15   : > { %v893_v13 = vcombine.high %v270_v9, %v274_v10  ;;  %v278_v16 = vld [vmem:[%s1011_s27 + $0x80] sm:$0xff]  ;;  %425 = vmatprep.subr.bf16.mxu0 %v885_v6  ;;  %v895_v17 = vcombine.high %v271_v14, %v275_v15  ;;  %v279_v19 = vld [vmem:[%s1011_s27 + $0x88] sm:$0xff]  ;;  %468 = vmatprep.subr.bf16.mxu1 %v887_v11  ;;  %v892_v21 = vcombine.low %v270_v9, %v274_v10  ;;  %v272_v33 = vld [vmem:[%s1011_s27 + $0x50] sm:$0xff] }
  0x16   : > { %v282_v18 = vld [vmem:[%s1011_s27 + $0xa0] sm:$0xff]  ;;  %v283_v20 = vld [vmem:[%s1011_s27 + $0xa8] sm:$0xff]  ;;  %426 = vmatpush1.bf16.msra.mxu0 %v884_v8  ;;  %469 = vmatpush1.bf16.msra.mxu1 %v886_v12  ;;  %v894_v22 = vcombine.low %v271_v14, %v275_v15  ;;  %v891_v32 = vcombine.high %v265_v27, %v269_v28  ;;  %v276_v34 = vld [vmem:[%s1011_s27 + $0x70] sm:$0xff]  ;;  %v890_v39 = vcombine.low %v265_v27, %v269_v28 }
  0x17   : > { %427 = vmatprep.subr.bf16.mxu0 %v893_v13  ;;  %v901_v23 = vcombine.high %v278_v16, %v282_v18  ;;  %470 = vmatprep.subr.bf16.mxu1 %v895_v17  ;;  %v903_v24 = vcombine.high %v279_v19, %v283_v20  ;;  %v900_v29 = vcombine.low %v278_v16, %v282_v18  ;;  %v273_v36 = vld [vmem:[%s1011_s27 + $0x58] sm:$0xff]  ;;  %v280_v42 = vld [vmem:[%s1011_s27 + $0x90] sm:$0xff] }
  0x18   : > { %v902_v30 = vcombine.low %v279_v19, %v283_v20  ;;  %v277_v37 = vld [vmem:[%s1011_s27 + $0x78] sm:$0xff]  ;;  %v897_v40 = vcombine.high %v272_v33, %v276_v34  ;;  %v284_v43 = vld [vmem:[%s1011_s27 + $0xb0] sm:$0xff]  ;;  %v896_v46 = vcombine.low %v272_v33, %v276_v34 }
  0x19   : > { %v899_v41 = vcombine.high %v273_v36, %v277_v37  ;;  %v281_v44 = vld [vmem:[%s1011_s27 + $0x98] sm:$0xff]  ;;  %v898_v47 = vcombine.low %v273_v36, %v277_v37  ;;  %v905_v48 = vcombine.high %v280_v42, %v284_v43  ;;  %v904_v50 = vcombine.low %v280_v42, %v284_v43 }
  0x1a   : > { %428 = vmatpush1.bf16.msra.mxu0 %v892_v21  ;;  %471 = vmatpush1.bf16.msra.mxu1 %v894_v22  ;;  %v285_v45 = vld [vmem:[%s1011_s27 + $0xb8] sm:$0xff]  ;;  %s922_s27 = sshll.u32 %s1208_s19, 6 }
  0x1b   : > { %429 = vmatprep.subr.bf16.mxu0 %v901_v23  ;;  %472 = vmatprep.subr.bf16.mxu1 %v903_v24  ;;  %v907_v49 = vcombine.high %v281_v44, %v285_v45  ;;  %v906_v51 = vcombine.low %v281_v44, %v285_v45 }
  0x1e   : > { %430 = vmatpush1.bf16.msra.mxu0 %v900_v29  ;;  %473 = vmatpush1.bf16.msra.mxu1 %v902_v30 }
  0x1f   : > { %511 = vmatprep.subr.bf16.mxu0 %v889_v31  ;;  %554 = vmatprep.subr.bf16.mxu1 %v891_v32 }
  0x21   : > { %908 = vmatmul.mubr.msk.bf16.vlgmr.msra.gmra.mrb[0].mxu0 %vm421_vm0, %v946_v35  ;;  %909 = vmatmul.mubr.msk.bf16.vlgmr.msra.gmra.mrb[0].mxu1 %vm421_vm0, %v946_v35 }
  0x22   : > { %512 = vmatpush1.bf16.msra.mxu0 %v888_v38  ;;  %555 = vmatpush1.bf16.msra.mxu1 %v890_v39 }
  0x23   : > { %513 = vmatprep.subr.bf16.mxu0 %v897_v40  ;;  %556 = vmatprep.subr.bf16.mxu1 %v899_v41 }
  0x24   : > { %543 = vmatprep.mubr.bf16.mxu0 %v957_v0  ;;  %586 = vmatprep.mubr.bf16.mxu1 %v957_v0 }
  0x26   : > { %514 = vmatpush1.bf16.msra.mxu0 %v896_v46  ;;  %557 = vmatpush1.bf16.msra.mxu1 %v898_v47 }
  0x27   : > { %515 = vmatprep.subr.bf16.mxu0 %v905_v48  ;;  %558 = vmatprep.subr.bf16.mxu1 %v907_v49 }
  0x2a   : > { %516 = vmatpush1.bf16.msra.mxu0 %v904_v50  ;;  %559 = vmatpush1.bf16.msra.mxu1 %v906_v51 }
  0x2d   : > { %910 = vmatmul.mubr.msk.bf16.vlgmr.msra.gmra.mrb[4].mxu0 %vm421_vm0, %v946_v35  ;;  %911 = vmatmul.mubr.msk.bf16.vlgmr.msra.gmra.mrb[4].mxu1 %vm421_vm0, %v946_v35 }
  0x87   : > { %v289_v52 = vpop.permute.xlu0 %288 }
  0x8b   : > { %v294_v17 = vpop.permute.xlu0 %293 }
  0xf4   : > { %v459_v53 = vpop.f32.mrb[0].mxu0  ;;  %v502_v56 = vpop.f32.mrb[0].mxu1 }
  0xf5   : > { %v460_v54 = vadd.f32 %v459_v53, %v289_v52  ;;  %v461_v55 = vpop.f32.mrb[1].mxu0  ;;  %v504_v59 = vpop.f32.mrb[1].mxu1  ;;  %v503_v0 = vadd.f32 %v502_v56, %v289_v52 }
  0xf6   : > { %v462_v57 = vadd.f32 %v461_v55, %v289_v52  ;;  %v463_v58 = vpop.f32.mrb[2].mxu0  ;;  %v506_v61 = vpop.f32.mrb[2].mxu1  ;;  %v505_v2 = vadd.f32 %v504_v59, %v289_v52 }
  0xf7   : > { %v465_v60 = vpop.f32.mrb[3].mxu0  ;;  %v508_v62 = vpop.f32.mrb[3].mxu1  ;;  %v464_v20 = vadd.f32 %v463_v58, %v294_v17  ;;  %v507_v24 = vadd.f32 %v506_v61, %v294_v17 }
  0xf8   : > { %v597_v63 = vadd.f32 %v462_v57, %v460_v54  ;;  %v466_v22 = vadd.f32 %v465_v60, %v294_v17  ;;  %v509_v26 = vadd.f32 %v508_v62, %v294_v17 }
  0xfa   : > { %v598_v1 = vadd.f32 %v597_v63, %v503_v0 }
  0xfc   : > { %v599_v4 = vadd.f32 %v598_v1, %v505_v2 }
 0x100   : > { %v545_v3 = vpop.f32.mrb[4].mxu0  ;;  %v588_v6 = vpop.f32.mrb[4].mxu1 }
 0x101   : > { %v546_v5 = vadd.f32 %v545_v3, %v289_v52  ;;  %v547_v7 = vpop.f32.mrb[5].mxu0  ;;  %v590_v9 = vpop.f32.mrb[5].mxu1  ;;  %v589_v15 = vadd.f32 %v588_v6, %v289_v52 }
 0x102   : > { %v548_v8 = vadd.f32 %v547_v7, %v289_v52  ;;  %v549_v10 = vpop.f32.mrb[6].mxu0  ;;  %v592_v12 = vpop.f32.mrb[6].mxu1  ;;  %v591_v18 = vadd.f32 %v590_v9, %v289_v52 }
 0x103   : > { %v600_v11 = vadd.f32 %v599_v4, %v546_v5  ;;  %v551_v13 = vpop.f32.mrb[7].mxu0  ;;  %v594_v14 = vpop.f32.mrb[7].mxu1  ;;  %v550_v28 = vadd.f32 %v549_v10, %v294_v17  ;;  %v593_v32 = vadd.f32 %v592_v12, %v294_v17 }
 0x104   : > { %v552_v31 = vadd.f32 %v551_v13, %v294_v17  ;;  %v595_v34 = vadd.f32 %v594_v14, %v294_v17 }
 0x105   : > { %v601_v16 = vadd.f32 %v600_v11, %v548_v8 }
 0x107   : > { %v602_v19 = vadd.f32 %v601_v16, %v589_v15 }
 0x109   : > { %v603_v21 = vadd.f32 %v602_v19, %v591_v18 }
 0x10b   : > { %v604_v23 = vadd.f32 %v603_v21, %v464_v20 }
 0x10d   : > { %v605_v25 = vadd.f32 %v604_v23, %v466_v22 }
 0x10f   : > { %v606_v27 = vadd.f32 %v605_v25, %v507_v24 }
 0x111   : > { %v607_v29 = vadd.f32 %v606_v27, %v509_v26 }
 0x113   : > { %v608_v30 = vadd.f32 %v607_v29, %v550_v28 }
 0x115   : > { %v609_v33 = vadd.f32 %v608_v30, %v552_v31 }
 0x117   : > { %v610_v35 = vadd.f32 %v609_v33, %v593_v32 }
 0x119   : > { %v611_v36 = vadd.f32 %v610_v35, %v595_v34 }
 0x11b   : > { %612 = vadd.xlane.f32.xlu1 %v611_v36 }
 0x1a8   : > { %v613_v37 = vpop.xlane.xlu1 %612 }
 0x1a9   : > { %v614_v38 = vrot.slane %v613_v37, 4 }
 0x1ab   : > { %v615_v39 = vadd.f32 %v614_v38, %v613_v37 }
 0x1ad   : > { %v616_v40 = vrot.slane %v615_v39, 2 }
 0x1af   : > { %v617_v41 = vadd.f32 %v616_v40, %v615_v39  ;;  %v230_v40 = vld [vmem:[%s1204_s3] sm:$0xff] }
 0x1b1   : > { %v618_v42 = vrot.slane %v617_v41, 1 }
 0x1b3   : > { %v619_v43 = vadd.f32 %v618_v42, %v617_v41  ;;  %v231_v41 = vld [vmem:[%s1204_s3 + $0x8] sm:$0xff]  ;;  %v232_v42 = vld [vmem:[%s1204_s3 + $0x10] sm:$0xff] }
 0x1b5   : > { %932 = vpush %v619_v43  ;;  %v233_v43 = vld [vmem:[%s1204_s3 + $0x18] sm:$0xff] }
 0x1e6   : > { %s933_s30 = spop %932 }
 0x1e7   : > { %v621_v44 = vstv %s933_s30  ;;  %s224_s30 = scalar_lea.vmem %s1206_s5, %s922_s27 }
 0x1e8   : > { %v623_v45 = vmul.f32 6.1035156e-05, %v621_v44  ;;  %v234_v44 = vld [vmem:[%s1204_s3 + $0x20] sm:$0xff] }
 0x1ea   : > { %v1046_v46 = vsub.f32 %v460_v54, %v623_v45  ;;  %v1048_v47 = vsub.f32 %v462_v57, %v623_v45  ;;  %v1050_v48 = vsub.f32 %v503_v0, %v623_v45  ;;  %v1056_v51 = vsub.f32 %v505_v2, %v623_v45 }
 0x1eb   : > { %v1058_v52 = vsub.f32 %v546_v5, %v623_v45  ;;  %v1062_v54 = vsub.f32 %v548_v8, %v623_v45  ;;  %v1066_v58 = vsub.f32 %v589_v15, %v623_v45  ;;  %v1070_v61 = vsub.f32 %v591_v18, %v623_v45 }
 0x1ec   : > { %v640_v49 = vmul.f32 %v1046_v46, %v1046_v46  ;;  %v641_v50 = vmul.f32 %v1048_v47, %v1048_v47  ;;  %v642_v53 = vmul.f32 %v1050_v48, %v1050_v48  ;;  %v643_v56 = vmul.f32 %v1056_v51, %v1056_v51 }
 0x1ed   : > { %v644_v59 = vmul.f32 %v1058_v52, %v1058_v52  ;;  %v645_v62 = vmul.f32 %v1062_v54, %v1062_v54  ;;  %v1074_v0 = vsub.f32 %v464_v20, %v623_v45  ;;  %v646_v1 = vmul.f32 %v1066_v58, %v1066_v58 }
 0x1ee   : > { %v656_v55 = vadd.f32 %v641_v50, %v640_v49  ;;  %v633_v3 = vsub.f32 %v466_v22, %v623_v45  ;;  %v647_v4 = vmul.f32 %v1070_v61, %v1070_v61  ;;  %v1080_v6 = vsub.f32 %v507_v24, %v623_v45 }
 0x1ef   : > { %v648_v7 = vmul.f32 %v1074_v0, %v1074_v0  ;;  %v635_v9 = vsub.f32 %v509_v26, %v623_v45  ;;  %v636_v12 = vsub.f32 %v550_v28, %v623_v45  ;;  %v637_v15 = vsub.f32 %v552_v31, %v623_v45 }
 0x1f0   : > { %v657_v57 = vadd.f32 %v656_v55, %v642_v53  ;;  %v649_v10 = vmul.f32 %v633_v3, %v633_v3  ;;  %v650_v13 = vmul.f32 %v1080_v6, %v1080_v6  ;;  %v638_v18 = vsub.f32 %v593_v32, %v623_v45  ;;  %v236_v55 = vld [vmem:[%s1204_s3 + $0x30] sm:$0xff] }
 0x1f1   : > { %v651_v16 = vmul.f32 %v635_v9, %v635_v9  ;;  %v652_v19 = vmul.f32 %v636_v12, %v636_v12  ;;  %v639_v21 = vsub.f32 %v595_v34, %v623_v45  ;;  %v653_v22 = vmul.f32 %v637_v15, %v637_v15  ;;  %v235_v45 = vld [vmem:[%s1204_s3 + $0x28] sm:$0xff] }
 0x1f2   : > { %v658_v60 = vadd.f32 %v657_v57, %v643_v56  ;;  %v654_v24 = vmul.f32 %v638_v18, %v638_v18  ;;  %v237_v56 = vld [vmem:[%s1204_s3 + $0x38] sm:$0xff]  ;;  %v238_v57 = vld [vmem:[%s1204_s3 + $0x40] sm:$0xff] }
 0x1f3   : > { %v655_v27 = vmul.f32 %v639_v21, %v639_v21 }
 0x1f4   : > { %v659_v63 = vadd.f32 %v658_v60, %v644_v59  ;;  %v240_v60 = vld [vmem:[%s1204_s3 + $0x50] sm:$0xff] }
 0x1f6   : > { %v660_v2 = vadd.f32 %v659_v63, %v645_v62  ;;  %v241_v62 = vld [vmem:[%s1204_s3 + $0x58] sm:$0xff] }
 0x1f8   : > { %v661_v5 = vadd.f32 %v660_v2, %v646_v1  ;;  %v243_v2 = vld [vmem:[%s1204_s3 + $0x68] sm:$0xff] }
 0x1fa   : > { %v662_v8 = vadd.f32 %v661_v5, %v647_v4  ;;  %v244_v4 = vld [vmem:[%s1204_s3 + $0x70] sm:$0xff] }
 0x1fc   : > { %v663_v11 = vadd.f32 %v662_v8, %v648_v7  ;;  %v247_v8 = vld [vmem:[%s1205_s4 + $0x8] sm:$0xff] }
 0x1fe   : > { %v664_v14 = vadd.f32 %v663_v11, %v649_v10 }
 0x200   : > { %v665_v17 = vadd.f32 %v664_v14, %v650_v13 }
 0x202   : > { %v666_v20 = vadd.f32 %v665_v17, %v651_v16 }
 0x204   : > { %v667_v23 = vadd.f32 %v666_v20, %v652_v19  ;;  %v252_v20 = vld [vmem:[%s1205_s4 + $0x30] sm:$0xff] }
 0x206   : > { %v668_v25 = vadd.f32 %v667_v23, %v653_v22  ;;  %v253_v22 = vld [vmem:[%s1205_s4 + $0x38] sm:$0xff] }
 0x208   : > { %v669_v26 = vadd.f32 %v668_v25, %v654_v24 }
 0x20a   : > { %v670_v29 = vadd.f32 %v669_v26, %v655_v27  ;;  %v255_v26 = vld [vmem:[%s1205_s4 + $0x48] sm:$0xff] }
 0x20c   : > { %671 = vadd.xlane.f32.xlu1 %v670_v29  ;;  %v256_v29 = vld [vmem:[%s1205_s4 + $0x50] sm:$0xff] }
 0x299   : > { %v672_v28 = vpop.xlane.xlu1 %671 }
 0x29a   : > { %v673_v30 = vrot.slane %v672_v28, 4 }
 0x29c   : > { %v674_v33 = vadd.f32 %v673_v30, %v672_v28 }
 0x29e   : > { %v675_v35 = vrot.slane %v674_v33, 2 }
 0x2a0   : > { %v676_v36 = vadd.f32 %v675_v35, %v674_v33 }
 0x2a2   : > { %v677_v31 = vrot.slane %v676_v36, 1 }
 0x2a4   : > { %v678_v37 = vadd.f32 %v677_v31, %v676_v36  ;;  %v257_v36 = vld [vmem:[%s1205_s4 + $0x58] sm:$0xff]  ;;  %v258_v31 = vld [vmem:[%s1205_s4 + $0x60] sm:$0xff] }
 0x2a6   : > { %934 = vpush %v678_v37  ;;  %v259_v37 = vld [vmem:[%s1205_s4 + $0x68] sm:$0xff] }
 0x2d7   : > { %s935_s6 = spop %934 }
 0x2d8   : > { %v680_v32 = vstv %s935_s6 }
 0x2d9   : > { %v681_v38 = vmul.f32 6.1035156e-05, %v680_v32 }
 0x2db   : > { %v682_v34 = vadd.f32 1e-05, %v681_v38 }
 0x2dd   : > { %947 = vrsqrt.f32 %v682_v34 }
 0x2e7   : > { %v948_v39 = vpop.eup %947 }
 0x2e8   : > { %v684_v49 = vmul.f32 %v948_v39, %v1046_v46  ;;  %v685_v50 = vmul.f32 %v948_v39, %v1048_v47  ;;  %v686_v53 = vmul.f32 %v948_v39, %v1050_v48  ;;  %v687_v59 = vmul.f32 %v948_v39, %v1056_v51  ;;  %v239_v48 = vld [vmem:[%s1204_s3 + $0x48] sm:$0xff] }
 0x2e9   : > { %v688_v46 = vmul.f32 %v948_v39, %v1058_v52  ;;  %v689_v47 = vmul.f32 %v948_v39, %v1062_v54  ;;  %v690_v63 = vmul.f32 %v948_v39, %v1066_v58  ;;  %v691_v51 = vmul.f32 %v948_v39, %v1070_v61  ;;  %v242_v54 = vld [vmem:[%s1204_s3 + $0x60] sm:$0xff] }
 0x2ea   : > { %v692_v52 = vmul.f32 %v948_v39, %v1074_v0  ;;  %v693_v1 = vmul.f32 %v948_v39, %v633_v3  ;;  %v694_v5 = vmul.f32 %v948_v39, %v1080_v6  ;;  %v695_v58 = vmul.f32 %v948_v39, %v635_v9  ;;  %v245_v0 = vld [vmem:[%s1204_s3 + $0x78] sm:$0xff]  ;;  %v246_v3 = vld [vmem:[%s1205_s4] sm:$0xff]  ;;  %v248_v6 = vld [vmem:[%s1205_s4 + $0x10] sm:$0xff] }
 0x2eb   : > { %v696_v7 = vmul.f32 %v948_v39, %v636_v12  ;;  %v697_v61 = vmul.f32 %v948_v39, %v637_v15  ;;  %v698_v10 = vmul.f32 %v948_v39, %v638_v18  ;;  %v700_v11 = vmul.f32 %v684_v49, %v230_v40  ;;  %v249_v9 = vld [vmem:[%s1205_s4 + $0x18] sm:$0xff]  ;;  %v250_v12 = vld [vmem:[%s1205_s4 + $0x20] sm:$0xff]  ;;  %v251_v18 = vld [vmem:[%s1205_s4 + $0x28] sm:$0xff] }
 0x2ec   : > { %v701_v13 = vmul.f32 %v685_v50, %v231_v41  ;;  %v702_v14 = vmul.f32 %v686_v53, %v232_v42  ;;  %v699_v15 = vmul.f32 %v948_v39, %v639_v21  ;;  %v703_v16 = vmul.f32 %v687_v59, %v233_v43  ;;  %v254_v21 = vld [vmem:[%s1205_s4 + $0x40] sm:$0xff]  ;;  %v260_v40 = vld [vmem:[%s1205_s4 + $0x70] sm:$0xff] }
 0x2ed   : > { %v704_v17 = vmul.f32 %v688_v46, %v234_v44  ;;  %v705_v19 = vmul.f32 %v689_v47, %v235_v45  ;;  %v706_v23 = vmul.f32 %v690_v63, %v236_v55  ;;  %v707_v24 = vmul.f32 %v691_v51, %v237_v56  ;;  %v261_v45 = vld [vmem:[%s1205_s4 + $0x78] sm:$0xff] }
 0x2ee   : > { %v708_v25 = vmul.f32 %v692_v52, %v238_v57  ;;  %v709_v27 = vmul.f32 %v693_v1, %v239_v48  ;;  %v710_v28 = vmul.f32 %v694_v5, %v240_v60  ;;  %v711_v30 = vmul.f32 %v695_v58, %v241_v62 }
 0x2ef   : > { %v712_v33 = vmul.f32 %v696_v7, %v242_v54  ;;  %v713_v35 = vmul.f32 %v697_v61, %v243_v2  ;;  %v714_v32 = vmul.f32 %v698_v10, %v244_v4  ;;  %v716_v38 = vadd.f32 %v700_v11, %v246_v3 }
 0x2f0   : > { %v717_v34 = vadd.f32 %v701_v13, %v247_v8  ;;  %v718_v39 = vadd.f32 %v702_v14, %v248_v6  ;;  %v715_v41 = vmul.f32 %v699_v15, %v245_v0  ;;  %v719_v42 = vadd.f32 %v703_v16, %v249_v9 }
 0x2f1   : > { %v720_v43 = vadd.f32 %v704_v17, %v250_v12  ;;  %v721_v44 = vadd.f32 %v705_v19, %v251_v18  ;;  %v722_v49 = vadd.f32 %v706_v23, %v252_v20  ;;  %v723_v50 = vadd.f32 %v707_v24, %v253_v22 }
 0x2f2   : > { %v724_v53 = vadd.f32 %v708_v25, %v254_v21  ;;  %v725_v55 = vadd.f32 %v709_v27, %v255_v26  ;;  %v726_v56 = vadd.f32 %v710_v28, %v256_v29  ;;  %v727_v57 = vadd.f32 %v711_v30, %v257_v36 }
 0x2f3   : > { %v728_v59 = vadd.f32 %v712_v33, %v258_v31  ;;  %v729_v46 = vadd.f32 %v713_v35, %v259_v37  ;;  %v730_v47 = vadd.f32 %v714_v32, %v260_v40  ;;  %v732_v48 = vmul.f32 0.2, %v716_v38 }
 0x2f4   : > { %v733_v60 = vmul.f32 0.2, %v717_v34  ;;  %v734_v62 = vmul.f32 0.2, %v718_v39  ;;  %v731_v63 = vadd.f32 %v715_v41, %v261_v45  ;;  %v735_v51 = vmul.f32 0.2, %v719_v42 }
 0x2f5   : > { %v736_v52 = vmul.f32 0.2, %v720_v43  ;;  %v737_v1 = vmul.f32 0.2, %v721_v44  ;;  %v738_v54 = vmul.f32 0.2, %v722_v49  ;;  %v748_v5 = vmax.f32 %v716_v38, %v732_v48 }
 0x2f6   : > { %v739_v2 = vmul.f32 0.2, %v723_v50  ;;  %v740_v4 = vmul.f32 0.2, %v724_v53  ;;  %v741_v58 = vmul.f32 0.2, %v725_v55  ;;  %v749_v0 = vmax.f32 %v717_v34, %v733_v60 }
 0x2f7   : > { %v742_v7 = vmul.f32 0.2, %v726_v56  ;;  %v743_v61 = vmul.f32 0.2, %v727_v57  ;;  %v744_v3 = vmul.f32 0.2, %v728_v59  ;;  %v750_v11 = vmax.f32 %v718_v39, %v734_v62 }
 0x2f8   : > { %v745_v8 = vmul.f32 0.2, %v729_v46  ;;  %v746_v10 = vmul.f32 0.2, %v730_v47  ;;  %v747_v13 = vmul.f32 0.2, %v731_v63  ;;  %v751_v14 = vmax.f32 %v719_v42, %v735_v51 }
 0x2f9   : > { %v752_v6 = vmax.f32 %v720_v43, %v736_v52  ;;  %v753_v9 = vmax.f32 %v721_v44, %v737_v1  ;;  %v754_v12 = vmax.f32 %v722_v49, %v738_v54  ;;  %v755_v15 = vmax.f32 %v723_v50, %v739_v2 }
 0x2fa   : > { %v756_v16 = vmax.f32 %v724_v53, %v740_v4  ;;  %v757_v17 = vmax.f32 %v725_v55, %v741_v58  ;;  %v758_v19 = vmax.f32 %v726_v56, %v742_v7  ;;  %v759_v18 = vmax.f32 %v727_v57, %v743_v61 }
 0x2fb   : > { %v760_v20 = vmax.f32 %v728_v59, %v744_v3  ;;  %v761_v22 = vmax.f32 %v729_v46, %v745_v8  ;;  %v762_v23 = vmax.f32 %v730_v47, %v746_v10  ;;  %v763_v24 = vmax.f32 %v731_v63, %v747_v13 }
 0x2fc   : > { %v923_v25 = vpack.c.bf16 %v749_v0, %v748_v5  ;;  %v924_v27 = vpack.c.bf16 %v751_v14, %v750_v11  ;;  %v925_v21 = vpack.c.bf16 %v753_v9, %v752_v6  ;;  %v926_v26 = vpack.c.bf16 %v755_v15, %v754_v12 }
 0x2fd   : > { %v927_v29 = vpack.c.bf16 %v757_v17, %v756_v16  ;;  %v928_v28 = vpack.c.bf16 %v759_v18, %v758_v19  ;;  %v929_v30 = vpack.c.bf16 %v761_v22, %v760_v20  ;;  %v930_v33 = vpack.c.bf16 %v763_v24, %v762_v23 }
 0x2fe   : > { %812 = vst [vmem:[%s224_s30] sm:$0xff] %v923_v25  ;;  %813 = vst [vmem:[%s224_s30 + $0x8] sm:$0xff] %v924_v27 }
 0x2ff   : > { %814 = vst [vmem:[%s224_s30 + $0x10] sm:$0xff] %v925_v21  ;;  %815 = vst [vmem:[%s224_s30 + $0x18] sm:$0xff] %v926_v26 }
 0x300   : > { %816 = vst [vmem:[%s224_s30 + $0x20] sm:$0xff] %v927_v29  ;;  %817 = vst [vmem:[%s224_s30 + $0x28] sm:$0xff] %v928_v28 }
 0x301   : > { %818 = vst [vmem:[%s224_s30 + $0x30] sm:$0xff] %v929_v30  ;;  %819 = vst [vmem:[%s224_s30 + $0x38] sm:$0xff] %v930_v33 }
 0x302 PF: > { %s15_s18 = sadd.s32 1, %s955_s18  }
 0x303   : > { %p12_p4 = scmp.ge.s32.totalorder %s15_s18, 4  }
 0x305   :  { %14 = sbr.rel (!%p12_p4) target bundleno = 1 (0x1), region = 70 }

// kernel: critic_forward.5
= control target key start
LH: loop header
LB: loop body
LE: loop exit
PB: predicated region body
PF: predicated region fallthrough
CT: control target
= control target key end

     0   :  { %s911_s18 = smov 0   ;;  %s1038_s0 = inlined_call_operand.vmem [shape: bf16[2,256,256], index: 0, kind: input, shape index: {}]   ;;  %s1039_s1 = inlined_call_operand.vmem [shape: bf16[32,256], index: 1, kind: input, shape index: {}]   ;;  %s1040_s2 = inlined_call_operand.vmem [shape: f32[32,1], index: 2, kind: input, shape index: {}]   ;;  %s1041_s3 = inlined_call_operand.vmem [shape: f32[32,256], index: 3, kind: input, shape index: {}]   ;;  %s1042_s4 = inlined_call_operand.vmem [shape: f32[32,256], index: 4, kind: input, shape index: {}]   ;;  %s1043_s5 = inlined_call_operand.vmem [shape: bf16[2,32,256], index: 5, kind: output, shape index: {}]  }
   0x1 LB: > { %s712_s19 = sadd.s32 4294967295, %s878_s18   ;;  %p716_p0 = scmp.ge.s32.totalorder %s878_s18, 1  ;;  %s878_s18 = sphi %s911_s18, %s15_s18  }
   0x2   : > { %p187_p1 = scmp.lt.s32.totalorder %s878_s18, 3 }
   0x4   : > { %p188_p2 = pnand %p716_p0, %p187_p1 }
   0x5   : > { %p215_p3 = scmp.lt.s32.totalorder (!%p188_p2), %s712_s19, 1  ;;  %v866_v0 = vld [vmem:[%s1039_s1 + $0x4] ss:$8 sps:$4 sm:$0xff] (!%p188_p2)   ;;  %v880_v1 = vmov (!%p188_p2), 0   ;;  %v869_v2 = vld [vmem:[%s1039_s1 + $0x14] ss:$8 sps:$4 sm:$0xff] (!%p188_p2)  }
   0x6   : > { %191 = sbr.rel (%p188_p2) target bundleno = 770 (0x302), region = 40  ;;  %814 = vset.pattern.permute.xlu0 (!%p188_p2), %v880_v1  ;;  %815 = vset.pattern.permute.xlu1 (!%p188_p2), %v880_v1  ;;  %v229_v3 = vld [vmem:[%s1040_s2] sm:$0xff] (!%p188_p2)  ;;  %v231_v4 = vld [vmem:[%s1040_s2 + $0x10] sm:$0xff] (!%p188_p2)  ;;  %v230_v5 = vld [vmem:[%s1040_s2 + $0x8] sm:$0xff] (!%p188_p2) }
   0x7   : > { %513 = vmatprep.mubr.bf16.mxu0 (!%p188_p2), %v866_v0  ;;  %283 = vperm.xlu0 (!%p188_p2), %814, %v229_v3   ;;  %v232_v9 = vld [vmem:[%s1040_s2 + $0x18] sm:$0xff] (!%p188_p2)  ;;  %v864_v39 = vld [vmem:[%s1039_s1] ss:$8 sps:$4 sm:$0xff] (!%p188_p2)  }
   0x8   : > { %523 = vmatprep.mubr.bf16.mxu1 (!%p188_p2), %v869_v2  ;;  %293 = vperm.xlu1 (!%p188_p2), %815, %v231_v4   ;;  %v867_v40 = vld [vmem:[%s1039_s1 + $0x10] ss:$8 sps:$4 sm:$0xff] (!%p188_p2)  }
   0xb   : > { %288 = vperm.xlu0 (!%p188_p2), %814, %v230_v5  }
   0xc   : > { %298 = vperm.xlu1 (!%p188_p2), %815, %v232_v9  }
   0xd   : > { %s1045_s19 = smov (!%p215_p3, %s712_s19), 1 }
   0xe   : > { %s763_s28 = sshll.u32 %s1045_s19, 8 }
   0xf   : > { %s940_s8 = scalar_lea.vmem %s1038_s0, %s763_s28  ;;  %s764_s28 = sshll.u32 %s1045_s19, 5 }
  0x10   : > { %v816_v6 = vld [vmem:[%s940_s8 + $0x4] ss:$8 sps:$4 sm:$0xff]   ;;  %v818_v7 = vld [vmem:[%s940_s8] ss:$8 sps:$4 sm:$0xff]   ;;  %v819_v8 = vld [vmem:[%s940_s8 + $0x14] ss:$8 sps:$4 sm:$0xff]   ;;  %s224_s6 = scalar_lea.vmem %s1043_s5, %s764_s28 }
  0x11   : > { %481 = vmatprep.subr.bf16.mxu0 %v816_v6  ;;  %769 = vmatprep.subr.bf16.mxu1 %v816_v6  ;;  %v821_v10 = vld [vmem:[%s940_s8 + $0x10] ss:$8 sps:$4 sm:$0xff]   ;;  %v822_v11 = vld [vmem:[%s940_s8 + $0x24] ss:$8 sps:$4 sm:$0xff]   ;;  %v824_v12 = vld [vmem:[%s940_s8 + $0x20] ss:$8 sps:$4 sm:$0xff]  }
  0x12   : > { %482 = vmatpush1.bf16.msra.mxu0 %v818_v7  ;;  %785 = vmatpush1.bf16.msra.mxu1 %v818_v7  ;;  %v825_v13 = vld [vmem:[%s940_s8 + $0x34] ss:$8 sps:$4 sm:$0xff]   ;;  %v827_v14 = vld [vmem:[%s940_s8 + $0x30] ss:$8 sps:$4 sm:$0xff]   ;;  %v828_v15 = vld [vmem:[%s940_s8 + $0x44] ss:$8 sps:$4 sm:$0xff]  }
  0x13   : > { %483 = vmatprep.subr.bf16.mxu0 %v819_v8  ;;  %770 = vmatprep.subr.bf16.mxu1 %v819_v8  ;;  %v830_v16 = vld [vmem:[%s940_s8 + $0x40] ss:$8 sps:$4 sm:$0xff]   ;;  %v831_v17 = vld [vmem:[%s940_s8 + $0x54] ss:$8 sps:$4 sm:$0xff]   ;;  %v833_v18 = vld [vmem:[%s940_s8 + $0x50] ss:$8 sps:$4 sm:$0xff]  }
  0x14   : > { %v834_v19 = vld [vmem:[%s940_s8 + $0x64] ss:$8 sps:$4 sm:$0xff]   ;;  %v836_v20 = vld [vmem:[%s940_s8 + $0x60] ss:$8 sps:$4 sm:$0xff]   ;;  %v837_v21 = vld [vmem:[%s940_s8 + $0x74] ss:$8 sps:$4 sm:$0xff]  }
  0x15   : > { %v839_v22 = vld [vmem:[%s940_s8 + $0x70] ss:$8 sps:$4 sm:$0xff]   ;;  %v840_v23 = vld [vmem:[%s940_s8 + $0x84] ss:$8 sps:$4 sm:$0xff]   ;;  %v842_v24 = vld [vmem:[%s940_s8 + $0x80] ss:$8 sps:$4 sm:$0xff]  }
  0x16   : > { %484 = vmatpush1.bf16.msra.mxu0 %v821_v10  ;;  %786 = vmatpush1.bf16.msra.mxu1 %v821_v10  ;;  %v843_v25 = vld [vmem:[%s940_s8 + $0x94] ss:$8 sps:$4 sm:$0xff]   ;;  %v845_v26 = vld [vmem:[%s940_s8 + $0x90] ss:$8 sps:$4 sm:$0xff]   ;;  %v846_v27 = vld [vmem:[%s940_s8 + $0xa4] ss:$8 sps:$4 sm:$0xff]  }
  0x17   : > { %485 = vmatprep.subr.bf16.mxu0 %v822_v11  ;;  %771 = vmatprep.subr.bf16.mxu1 %v822_v11  ;;  %v848_v28 = vld [vmem:[%s940_s8 + $0xa0] ss:$8 sps:$4 sm:$0xff]   ;;  %v849_v29 = vld [vmem:[%s940_s8 + $0xb4] ss:$8 sps:$4 sm:$0xff]   ;;  %v851_v30 = vld [vmem:[%s940_s8 + $0xb0] ss:$8 sps:$4 sm:$0xff]  }
  0x18   : > { %v852_v31 = vld [vmem:[%s940_s8 + $0xc4] ss:$8 sps:$4 sm:$0xff]   ;;  %v854_v32 = vld [vmem:[%s940_s8 + $0xc0] ss:$8 sps:$4 sm:$0xff]   ;;  %v855_v33 = vld [vmem:[%s940_s8 + $0xd4] ss:$8 sps:$4 sm:$0xff]  }
  0x19   : > { %v857_v34 = vld [vmem:[%s940_s8 + $0xd0] ss:$8 sps:$4 sm:$0xff]   ;;  %v858_v35 = vld [vmem:[%s940_s8 + $0xe4] ss:$8 sps:$4 sm:$0xff]   ;;  %v860_v36 = vld [vmem:[%s940_s8 + $0xe0] ss:$8 sps:$4 sm:$0xff]  }
  0x1a   : > { %486 = vmatpush1.bf16.msra.mxu0 %v824_v12  ;;  %787 = vmatpush1.bf16.msra.mxu1 %v824_v12  ;;  %v861_v37 = vld [vmem:[%s940_s8 + $0xf4] ss:$8 sps:$4 sm:$0xff]   ;;  %v863_v38 = vld [vmem:[%s940_s8 + $0xf0] ss:$8 sps:$4 sm:$0xff]  }
  0x1b   : > { %487 = vmatprep.subr.bf16.mxu0 %v825_v13  ;;  %772 = vmatprep.subr.bf16.mxu1 %v825_v13 }
  0x1e   : > { %488 = vmatpush1.bf16.msra.mxu0 %v827_v14  ;;  %788 = vmatpush1.bf16.msra.mxu1 %v827_v14 }
  0x1f   : > { %489 = vmatprep.subr.bf16.mxu0 %v828_v15  ;;  %773 = vmatprep.subr.bf16.mxu1 %v828_v15 }
  0x22   : > { %490 = vmatpush1.bf16.msra.mxu0 %v830_v16  ;;  %789 = vmatpush1.bf16.msra.mxu1 %v830_v16 }
  0x23   : > { %491 = vmatprep.subr.bf16.mxu0 %v831_v17  ;;  %774 = vmatprep.subr.bf16.mxu1 %v831_v17 }
  0x26   : > { %492 = vmatpush1.bf16.msra.mxu0 %v833_v18  ;;  %790 = vmatpush1.bf16.msra.mxu1 %v833_v18 }
  0x27   : > { %493 = vmatprep.subr.bf16.mxu0 %v834_v19  ;;  %775 = vmatprep.subr.bf16.mxu1 %v834_v19 }
  0x2a   : > { %494 = vmatpush1.bf16.msra.mxu0 %v836_v20  ;;  %791 = vmatpush1.bf16.msra.mxu1 %v836_v20 }
  0x2b   : > { %495 = vmatprep.subr.bf16.mxu0 %v837_v21  ;;  %776 = vmatprep.subr.bf16.mxu1 %v837_v21 }
  0x2e   : > { %496 = vmatpush1.bf16.msra.mxu0 %v839_v22  ;;  %792 = vmatpush1.bf16.msra.mxu1 %v839_v22 }
  0x2f   : > { %497 = vmatprep.subr.bf16.mxu0 %v840_v23  ;;  %777 = vmatprep.subr.bf16.mxu1 %v840_v23 }
  0x32   : > { %498 = vmatpush1.bf16.msra.mxu0 %v842_v24  ;;  %793 = vmatpush1.bf16.msra.mxu1 %v842_v24 }
  0x33   : > { %499 = vmatprep.subr.bf16.mxu0 %v843_v25  ;;  %778 = vmatprep.subr.bf16.mxu1 %v843_v25 }
  0x36   : > { %500 = vmatpush1.bf16.msra.mxu0 %v845_v26  ;;  %794 = vmatpush1.bf16.msra.mxu1 %v845_v26 }
  0x37   : > { %501 = vmatprep.subr.bf16.mxu0 %v846_v27  ;;  %779 = vmatprep.subr.bf16.mxu1 %v846_v27 }
  0x3a   : > { %502 = vmatpush1.bf16.msra.mxu0 %v848_v28  ;;  %795 = vmatpush1.bf16.msra.mxu1 %v848_v28 }
  0x3b   : > { %503 = vmatprep.subr.bf16.mxu0 %v849_v29  ;;  %780 = vmatprep.subr.bf16.mxu1 %v849_v29 }
  0x3e   : > { %504 = vmatpush1.bf16.msra.mxu0 %v851_v30  ;;  %796 = vmatpush1.bf16.msra.mxu1 %v851_v30 }
  0x3f   : > { %505 = vmatprep.subr.bf16.mxu0 %v852_v31  ;;  %781 = vmatprep.subr.bf16.mxu1 %v852_v31 }
  0x42   : > { %506 = vmatpush1.bf16.msra.mxu0 %v854_v32  ;;  %797 = vmatpush1.bf16.msra.mxu1 %v854_v32 }
  0x43   : > { %507 = vmatprep.subr.bf16.mxu0 %v855_v33  ;;  %782 = vmatprep.subr.bf16.mxu1 %v855_v33 }
  0x46   : > { %508 = vmatpush1.bf16.msra.mxu0 %v857_v34  ;;  %798 = vmatpush1.bf16.msra.mxu1 %v857_v34 }
  0x47   : > { %509 = vmatprep.subr.bf16.mxu0 %v858_v35  ;;  %783 = vmatprep.subr.bf16.mxu1 %v858_v35 }
  0x4a   : > { %510 = vmatpush1.bf16.msra.mxu0 %v860_v36  ;;  %799 = vmatpush1.bf16.msra.mxu1 %v860_v36 }
  0x4b   : > { %511 = vmatprep.subr.bf16.mxu0 %v861_v37  ;;  %784 = vmatprep.subr.bf16.mxu1 %v861_v37 }
  0x4e   : > { %512 = vmatpush1.bf16.msra.mxu0 %v863_v38  ;;  %800 = vmatpush1.bf16.msra.mxu1 %v863_v38 }
  0x51   : > { %514 = vmatmul.mubr.bf16.vlgmr.msra.gmra.mrb[0].mxu0 %v864_v39  ;;  %524 = vmatmul.mubr.bf16.vlgmr.msra.gmra.mrb[0].mxu1 %v867_v40 }
  0x86   : > { %v284_v41 = vpop.permute.xlu0 %283 }
  0x87   : > { %v294_v43 = vpop.permute.xlu1 %293 }
  0x8a   : > { %v289_v42 = vpop.permute.xlu0 %288 }
  0x8b   : > { %v299_v60 = vpop.permute.xlu1 %298 }
 0x124   : > { %v515_v44 = vpop.f32.mrb[0].mxu0  ;;  %v525_v45 = vpop.f32.mrb[0].mxu1 }
 0x125   : > { %v516_v46 = vadd.f32 %v515_v44, %v284_v41  ;;  %v517_v47 = vpop.f32.mrb[1].mxu0  ;;  %v527_v48 = vpop.f32.mrb[1].mxu1  ;;  %v526_v58 = vadd.f32 %v525_v45, %v294_v43 }
 0x126   : > { %v518_v49 = vadd.f32 %v517_v47, %v284_v41  ;;  %v519_v50 = vpop.f32.mrb[2].mxu0  ;;  %v529_v51 = vpop.f32.mrb[2].mxu1  ;;  %v528_v62 = vadd.f32 %v527_v48, %v294_v43  ;;  %v234_v47 = vld [vmem:[%s1041_s3 + $0x8] sm:$0xff]  ;;  %v235_v48 = vld [vmem:[%s1041_s3 + $0x10] sm:$0xff] }
 0x127   : > { %v520_v52 = vadd.f32 %v519_v50, %v289_v42  ;;  %v521_v53 = vpop.f32.mrb[3].mxu0  ;;  %v531_v54 = vpop.f32.mrb[3].mxu1  ;;  %v530_v0 = vadd.f32 %v529_v51, %v299_v60  ;;  %v237_v51 = vld [vmem:[%s1041_s3 + $0x20] sm:$0xff] }
 0x128   : > { %v534_v55 = vadd.f32 %v518_v49, %v516_v46  ;;  %v522_v57 = vadd.f32 %v521_v53, %v289_v42  ;;  %v532_v1 = vadd.f32 %v531_v54, %v299_v60  ;;  %v239_v53 = vld [vmem:[%s1041_s3 + $0x30] sm:$0xff]  ;;  %v240_v54 = vld [vmem:[%s1041_s3 + $0x38] sm:$0xff] }
 0x12a   : > { %v535_v56 = vadd.f32 %v534_v55, %v520_v52  ;;  %v241_v55 = vld [vmem:[%s1042_s4] sm:$0xff] }
 0x12c   : > { %v536_v59 = vadd.f32 %v535_v56, %v522_v57  ;;  %v242_v56 = vld [vmem:[%s1042_s4 + $0x8] sm:$0xff] }
 0x12e   : > { %v537_v61 = vadd.f32 %v536_v59, %v526_v58 }
 0x130   : > { %v538_v63 = vadd.f32 %v537_v61, %v528_v62  ;;  %v243_v61 = vld [vmem:[%s1042_s4 + $0x10] sm:$0xff] }
 0x132   : > { %v539_v2 = vadd.f32 %v538_v63, %v530_v0  ;;  %v245_v63 = vld [vmem:[%s1042_s4 + $0x20] sm:$0xff] }
 0x134   : > { %v540_v3 = vadd.f32 %v539_v2, %v532_v1 }
 0x136   : > { %541 = vadd.xlane.f32.xlu0 %v540_v3 }
 0x1c3   : > { %v542_v4 = vpop.xlane.xlu0 %541 }
 0x1c4   : > { %v543_v5 = vrot.slane %v542_v4, 4 }
 0x1c6   : > { %v544_v6 = vadd.f32 %v543_v5, %v542_v4  ;;  %v246_v4 = vld [vmem:[%s1042_s4 + $0x28] sm:$0xff]  ;;  %v247_v5 = vld [vmem:[%s1042_s4 + $0x30] sm:$0xff] }
 0x1c8   : > { %v545_v7 = vrot.slane %v544_v6, 2 }
 0x1ca   : > { %v546_v8 = vadd.f32 %v545_v7, %v544_v6  ;;  %v248_v6 = vld [vmem:[%s1042_s4 + $0x38] sm:$0xff] }
 0x1cc   : > { %v547_v9 = vrot.slane %v546_v8, 1 }
 0x1ce   : > { %v548_v10 = vadd.f32 %v547_v9, %v546_v8 }
 0x1d0   : > { %801 = vpush %v548_v10 }
 0x201   : > { %s802_s15 = spop %801 }
 0x202   : > { %v550_v11 = vstv %s802_s15 }
 0x203   : > { %v552_v12 = vmul.f32 0.00012207031, %v550_v11 }
 0x205   : > { %v553_v13 = vsub.f32 %v516_v46, %v552_v12  ;;  %v554_v14 = vsub.f32 %v518_v49, %v552_v12  ;;  %v555_v15 = vsub.f32 %v520_v52, %v552_v12  ;;  %v556_v16 = vsub.f32 %v522_v57, %v552_v12  ;;  %v233_v46 = vld [vmem:[%s1041_s3] sm:$0xff]  ;;  %v236_v49 = vld [vmem:[%s1041_s3 + $0x18] sm:$0xff]  ;;  %v238_v52 = vld [vmem:[%s1041_s3 + $0x28] sm:$0xff] }
 0x206   : > { %v557_v19 = vsub.f32 %v526_v58, %v552_v12  ;;  %v558_v22 = vsub.f32 %v528_v62, %v552_v12  ;;  %v559_v25 = vsub.f32 %v530_v0, %v552_v12  ;;  %v560_v28 = vsub.f32 %v532_v1, %v552_v12  ;;  %v244_v62 = vld [vmem:[%s1042_s4 + $0x18] sm:$0xff] }
 0x207   : > { %v561_v17 = vmul.f32 %v553_v13, %v553_v13  ;;  %v562_v18 = vmul.f32 %v554_v14, %v554_v14  ;;  %v563_v20 = vmul.f32 %v555_v15, %v555_v15  ;;  %v564_v23 = vmul.f32 %v556_v16, %v556_v16 }
 0x208   : > { %v565_v26 = vmul.f32 %v557_v19, %v557_v19  ;;  %v566_v29 = vmul.f32 %v558_v22, %v558_v22  ;;  %v567_v31 = vmul.f32 %v559_v25, %v559_v25  ;;  %v568_v33 = vmul.f32 %v560_v28, %v560_v28 }
 0x209   : > { %v569_v21 = vadd.f32 %v562_v18, %v561_v17 }
 0x20b   : > { %v570_v24 = vadd.f32 %v569_v21, %v563_v20 }
 0x20d   : > { %v571_v27 = vadd.f32 %v570_v24, %v564_v23 }
 0x20f   : > { %v572_v30 = vadd.f32 %v571_v27, %v565_v26 }
 0x211   : > { %v573_v32 = vadd.f32 %v572_v30, %v566_v29 }
 0x213   : > { %v574_v34 = vadd.f32 %v573_v32, %v567_v31 }
 0x215   : > { %v575_v35 = vadd.f32 %v574_v34, %v568_v33 }
 0x217   : > { %576 = vadd.xlane.f32.xlu1 %v575_v35 }
 0x2a4   : > { %v577_v36 = vpop.xlane.xlu1 %576 }
 0x2a5   : > { %v578_v37 = vrot.slane %v577_v36, 4 }
 0x2a7   : > { %v579_v38 = vadd.f32 %v578_v37, %v577_v36 }
 0x2a9   : > { %v580_v39 = vrot.slane %v579_v38, 2 }
 0x2ab   : > { %v581_v40 = vadd.f32 %v580_v39, %v579_v38 }
 0x2ad   : > { %v582_v41 = vrot.slane %v581_v40, 1 }
 0x2af   : > { %v583_v42 = vadd.f32 %v582_v41, %v581_v40 }
 0x2b1   : > { %803 = vpush %v583_v42 }
 0x2e2   : > { %s804_s16 = spop %803 }
 0x2e3   : > { %v585_v43 = vstv %s804_s16 }
 0x2e4   : > { %v586_v44 = vmul.f32 0.00012207031, %v585_v43 }
 0x2e6   : > { %v587_v45 = vadd.f32 1e-05, %v586_v44 }
 0x2e8   : > { %870 = vrsqrt.f32 %v587_v45 }
 0x2f2   : > { %v871_v50 = vpop.eup %870 }
 0x2f3   : > { %v589_v57 = vmul.f32 %v871_v50, %v553_v13  ;;  %v590_v58 = vmul.f32 %v871_v50, %v554_v14  ;;  %v591_v59 = vmul.f32 %v871_v50, %v555_v15  ;;  %v592_v60 = vmul.f32 %v871_v50, %v556_v16 }
 0x2f4   : > { %v593_v0 = vmul.f32 %v871_v50, %v557_v19  ;;  %v594_v1 = vmul.f32 %v871_v50, %v558_v22  ;;  %v595_v2 = vmul.f32 %v871_v50, %v559_v25  ;;  %v596_v3 = vmul.f32 %v871_v50, %v560_v28 }
 0x2f5   : > { %v597_v7 = vmul.f32 %v589_v57, %v233_v46  ;;  %v598_v8 = vmul.f32 %v590_v58, %v234_v47  ;;  %v599_v9 = vmul.f32 %v591_v59, %v235_v48  ;;  %v600_v10 = vmul.f32 %v592_v60, %v236_v49 }
 0x2f6   : > { %v601_v11 = vmul.f32 %v593_v0, %v237_v51  ;;  %v602_v12 = vmul.f32 %v594_v1, %v238_v52  ;;  %v603_v13 = vmul.f32 %v595_v2, %v239_v53  ;;  %v604_v14 = vmul.f32 %v596_v3, %v240_v54 }
 0x2f7   : > { %v605_v15 = vadd.f32 %v597_v7, %v241_v55  ;;  %v606_v16 = vadd.f32 %v598_v8, %v242_v56  ;;  %v607_v17 = vadd.f32 %v599_v9, %v243_v61  ;;  %v608_v18 = vadd.f32 %v600_v10, %v244_v62 }
 0x2f8   : > { %v609_v19 = vadd.f32 %v601_v11, %v245_v63  ;;  %v610_v20 = vadd.f32 %v602_v12, %v246_v4  ;;  %v611_v21 = vadd.f32 %v603_v13, %v247_v5  ;;  %v612_v22 = vadd.f32 %v604_v14, %v248_v6 }
 0x2f9   : > { %v613_v23 = vmul.f32 0.2, %v605_v15  ;;  %v614_v24 = vmul.f32 0.2, %v606_v16  ;;  %v615_v25 = vmul.f32 0.2, %v607_v17 }
 0x2fa   : > { %v616_v26 = vmul.f32 0.2, %v608_v18  ;;  %v617_v27 = vmul.f32 0.2, %v609_v19  ;;  %v618_v28 = vmul.f32 0.2, %v610_v20 }
 0x2fb   : > { %v619_v29 = vmul.f32 0.2, %v611_v21  ;;  %v620_v30 = vmul.f32 0.2, %v612_v22  ;;  %v621_v31 = vmax.f32 %v605_v15, %v613_v23  ;;  %v622_v32 = vmax.f32 %v606_v16, %v614_v24 }
 0x2fc   : > { %v623_v33 = vmax.f32 %v607_v17, %v615_v25  ;;  %v624_v34 = vmax.f32 %v608_v18, %v616_v26  ;;  %v625_v35 = vmax.f32 %v609_v19, %v617_v27  ;;  %v626_v36 = vmax.f32 %v610_v20, %v618_v28 }
 0x2fd   : > { %v627_v37 = vmax.f32 %v611_v21, %v619_v29  ;;  %v628_v38 = vmax.f32 %v612_v22, %v620_v30  ;;  %v765_v39 = vpack.c.bf16 %v622_v32, %v621_v31 }
 0x2fe   : > { %v766_v40 = vpack.c.bf16 %v624_v34, %v623_v33  ;;  %v767_v41 = vpack.c.bf16 %v626_v36, %v625_v35 }
 0x2ff   : > { %v768_v42 = vpack.c.bf16 %v628_v38, %v627_v37  ;;  %653 = vst [vmem:[%s224_s6] sm:$0xff] %v765_v39 }
 0x300   : > { %654 = vst [vmem:[%s224_s6 + $0x8] sm:$0xff] %v766_v40  ;;  %655 = vst [vmem:[%s224_s6 + $0x10] sm:$0xff] %v767_v41 }
 0x301   : > { %656 = vst [vmem:[%s224_s6 + $0x18] sm:$0xff] %v768_v42 }
 0x302 PF: > { %s15_s18 = sadd.s32 1, %s878_s18  }
 0x303   : > { %p12_p4 = scmp.ge.s32.totalorder %s15_s18, 4  }
 0x305   :  { %14 = sbr.rel (!%p12_p4) target bundleno = 1 (0x1), region = 70 }

// kernel: critic_forward.6
= control target key start
LH: loop header
LB: loop body
LE: loop exit
PB: predicated region body
PF: predicated region fallthrough
CT: control target
= control target key end

     0   :  { %s1249_s18 = smov 0   ;;  %s1464_s0 = inlined_call_operand.vmem [shape: bf16[2,512,64], index: 0, kind: input, shape index: {}]   ;;  %s1465_s1 = inlined_call_operand.vmem [shape: bf16[64,512], index: 1, kind: input, shape index: {}]   ;;  %s1466_s2 = inlined_call_operand.vmem [shape: f32[64,1], index: 2, kind: input, shape index: {}]   ;;  %s1467_s3 = inlined_call_operand.vmem [shape: f32[64,64], index: 3, kind: input, shape index: {}]   ;;  %s1468_s4 = inlined_call_operand.vmem [shape: f32[64,64], index: 4, kind: input, shape index: {}]   ;;  %s1469_s5 = inlined_call_operand.vmem [shape: bf16[2,64,64], index: 5, kind: output, shape index: {}]  }
   0x1 LB: > { %s980_s19 = sadd.s32 4294967295, %s1216_s18   ;;  %p984_p0 = scmp.ge.s32.totalorder %s1216_s18, 1  ;;  %s1216_s18 = sphi %s1249_s18, %s15_s18  }
   0x2   : > { %p187_p1 = scmp.lt.s32.totalorder %s1216_s18, 3 }
   0x4   : > { %p188_p2 = pnand %p984_p0, %p187_p1 }
   0x5   : > { %p215_p3 = scmp.lt.s32.totalorder (!%p188_p2), %s980_s19, 1  ;;  %v1186_v0 = vld [vmem:[%s1465_s1 + $0x4] ss:$16 sps:$4 sm:$0xff] (!%p188_p2)   ;;  %v1218_v1 = vmov (!%p188_p2), 0   ;;  %v1189_v2 = vld [vmem:[%s1465_s1 + $0xc] ss:$16 sps:$4 sm:$0xff] (!%p188_p2)  }
   0x6   : > { %191 = sbr.rel (%p188_p2) target bundleno = 760 (0x2f8), region = 40  ;;  %1150 = vset.pattern.permute.xlu0 (!%p188_p2), %v1218_v1  ;;  %1151 = vset.pattern.permute.xlu1 (!%p188_p2), %v1218_v1  ;;  %v1184_v33 = vld [vmem:[%s1465_s1] ss:$16 sps:$4 sm:$0xff] (!%p188_p2)   ;;  %v1187_v35 = vld [vmem:[%s1465_s1 + $0x8] ss:$16 sps:$4 sm:$0xff] (!%p188_p2)   ;;  %vm772_vm0 = vcmask (!%p188_p2), 523264  }
   0x7   : > { %674 = vmatprep.mubr.bf16.mxu0 (!%p188_p2), %v1186_v0  ;;  %739 = vmatprep.mubr.bf16.mxu1 (!%p188_p2), %v1189_v2  ;;  %v1190_v37 = vld [vmem:[%s1465_s1 + $0x24] ss:$16 sps:$4 sm:$0xff] (!%p188_p2)   ;;  %v1192_v38 = vld [vmem:[%s1465_s1 + $0x2c] ss:$16 sps:$4 sm:$0xff] (!%p188_p2)   ;;  %v1194_v42 = vld [vmem:[%s1465_s1 + $0x20] ss:$16 sps:$4 sm:$0xff] (!%p188_p2)  }
   0x8   : > { %v242_v39 = vld [vmem:[%s1466_s2] sm:$0xff] (!%p188_p2)  ;;  %v244_v40 = vld [vmem:[%s1466_s2 + $0x10] sm:$0xff] (!%p188_p2)  ;;  %v243_v41 = vld [vmem:[%s1466_s2 + $0x8] sm:$0xff] (!%p188_p2)  ;;  %vm916_vm1 = vcmask (!%p188_p2), 519168  }
   0x9   : > { %332 = vperm.xlu0 (!%p188_p2), %1150, %v242_v39   ;;  %342 = vperm.xlu1 (!%p188_p2), %1151, %v244_v40   ;;  %v245_v43 = vld [vmem:[%s1466_s2 + $0x18] sm:$0xff] (!%p188_p2)  ;;  %v1196_v45 = vld [vmem:[%s1465_s1 + $0x44] ss:$16 sps:$4 sm:$0xff] (!%p188_p2)   ;;  %v247_v48 = vld [vmem:[%s1466_s2 + $0x28] sm:$0xff] (!%p188_p2) }
   0xa   : > { %v1195_v44 = vld [vmem:[%s1465_s1 + $0x28] ss:$16 sps:$4 sm:$0xff] (!%p188_p2)   ;;  %v1198_v46 = vld [vmem:[%s1465_s1 + $0x4c] ss:$16 sps:$4 sm:$0xff] (!%p188_p2)   ;;  %v246_v47 = vld [vmem:[%s1466_s2 + $0x20] sm:$0xff] (!%p188_p2) }
   0xb   : > { %v248_v49 = vld [vmem:[%s1466_s2 + $0x30] sm:$0xff] (!%p188_p2)  ;;  %v249_v51 = vld [vmem:[%s1466_s2 + $0x38] sm:$0xff] (!%p188_p2) }
   0xc   : > { %v1200_v50 = vld [vmem:[%s1465_s1 + $0x40] ss:$16 sps:$4 sm:$0xff] (!%p188_p2)   ;;  %v1201_v52 = vld [vmem:[%s1465_s1 + $0x48] ss:$16 sps:$4 sm:$0xff] (!%p188_p2)   ;;  %v1202_v53 = vld [vmem:[%s1465_s1 + $0x64] ss:$16 sps:$4 sm:$0xff] (!%p188_p2)  }
   0xd   : > { %s1471_s19 = smov (!%p215_p3, %s980_s19), 1  ;;  %337 = vperm.xlu0 %1150, %v243_v41   ;;  %347 = vperm.xlu1 %1151, %v245_v43   ;;  %v1204_v54 = vld [vmem:[%s1465_s1 + $0x6c] ss:$16 sps:$4 sm:$0xff]   ;;  %v1206_v55 = vld [vmem:[%s1465_s1 + $0x60] ss:$16 sps:$4 sm:$0xff]  }
   0xe   : > { %s1047_s24 = sshll.u32 %s1471_s19, 8  ;;  %v1207_v56 = vld [vmem:[%s1465_s1 + $0x68] ss:$16 sps:$4 sm:$0xff]   ;;  %s1048_s12 = sshll.u32 %s1471_s19, 5 }
   0xf   : > { %s1269_s27 = scalar_lea.vmem %s1464_s0, %s1047_s24  ;;  %s224_s15 = scalar_lea.vmem %s1469_s5, %s1048_s12 }
  0x10   : > { %v1152_v3 = vld [vmem:[%s1269_s27 + $0x40] sm:$0xff]   ;;  %v1156_v7 = vld [vmem:[%s1269_s27 + $0x48] sm:$0xff]   ;;  %v1160_v11 = vld [vmem:[%s1269_s27 + $0x50] sm:$0xff]  }
  0x11   : > { %v1153_v4 = vld [vmem:[%s1269_s27 + $0xc0] sm:$0xff]   ;;  %1057 = vmatprep.subr.bf16.mxu0 %v1152_v3  ;;  %v1157_v8 = vld [vmem:[%s1269_s27 + $0xc8] sm:$0xff]   ;;  %v1161_v12 = vld [vmem:[%s1269_s27 + $0xd0] sm:$0xff]   ;;  %352 = vperm.xlu0 %1150, %v246_v47  }
  0x12   : > { %v1154_v5 = vld [vmem:[%s1269_s27] sm:$0xff]   ;;  %1097 = vmatprep.subr.bf16.mxu1 %v1153_v4  ;;  %v1158_v9 = vld [vmem:[%s1269_s27 + $0x8] sm:$0xff]   ;;  %v1162_v13 = vld [vmem:[%s1269_s27 + $0x10] sm:$0xff]   ;;  %357 = vperm.xlu1 %1151, %v247_v48  }
  0x13   : > { %v1155_v6 = vld [vmem:[%s1269_s27 + $0x80] sm:$0xff]   ;;  %1058 = vmatpush3.bf16.msra.mxu0 %v1154_v5  ;;  %v1159_v10 = vld [vmem:[%s1269_s27 + $0x88] sm:$0xff]   ;;  %v1163_v14 = vld [vmem:[%s1269_s27 + $0x90] sm:$0xff]  }
  0x14   : > { %1098 = vmatpush3.bf16.msra.mxu1 %v1155_v6  ;;  %1059 = vmatprep.subr.bf16.mxu0 %v1156_v7  ;;  %v1164_v15 = vld [vmem:[%s1269_s27 + $0x58] sm:$0xff]   ;;  %v1168_v19 = vld [vmem:[%s1269_s27 + $0x60] sm:$0xff]   ;;  %v1172_v23 = vld [vmem:[%s1269_s27 + $0x68] sm:$0xff]  }
  0x15   : > { %1099 = vmatprep.subr.bf16.mxu1 %v1157_v8  ;;  %v1165_v16 = vld [vmem:[%s1269_s27 + $0xd8] sm:$0xff]   ;;  %v1169_v20 = vld [vmem:[%s1269_s27 + $0xe0] sm:$0xff]   ;;  %v1173_v24 = vld [vmem:[%s1269_s27 + $0xe8] sm:$0xff]   ;;  %362 = vperm.xlu0 %1150, %v248_v49  }
  0x16   : > { %v1166_v17 = vld [vmem:[%s1269_s27 + $0x18] sm:$0xff]   ;;  %v1170_v21 = vld [vmem:[%s1269_s27 + $0x20] sm:$0xff]   ;;  %v1174_v25 = vld [vmem:[%s1269_s27 + $0x28] sm:$0xff]   ;;  %367 = vperm.xlu1 %1151, %v249_v51  }
  0x17   : > { %1060 = vmatpush3.bf16.msra.mxu0 %v1158_v9  ;;  %v1167_v18 = vld [vmem:[%s1269_s27 + $0x98] sm:$0xff]   ;;  %v1171_v22 = vld [vmem:[%s1269_s27 + $0xa0] sm:$0xff]   ;;  %v1175_v26 = vld [vmem:[%s1269_s27 + $0xa8] sm:$0xff]  }
  0x18   : > { %1100 = vmatpush3.bf16.msra.mxu1 %v1159_v10  ;;  %1061 = vmatprep.subr.bf16.mxu0 %v1160_v11  ;;  %v1176_v27 = vld [vmem:[%s1269_s27 + $0x70] sm:$0xff]   ;;  %v1180_v31 = vld [vmem:[%s1269_s27 + $0x78] sm:$0xff]  }
  0x19   : > { %1101 = vmatprep.subr.bf16.mxu1 %v1161_v12  ;;  %v1177_v28 = vld [vmem:[%s1269_s27 + $0xf0] sm:$0xff]   ;;  %v1181_v32 = vld [vmem:[%s1269_s27 + $0xf8] sm:$0xff]  }
  0x1a   : > { %v1178_v29 = vld [vmem:[%s1269_s27 + $0x30] sm:$0xff]   ;;  %v1182_v34 = vld [vmem:[%s1269_s27 + $0x38] sm:$0xff]  }
  0x1b   : > { %1062 = vmatpush3.bf16.msra.mxu0 %v1162_v13  ;;  %v1179_v30 = vld [vmem:[%s1269_s27 + $0xb0] sm:$0xff]   ;;  %v1183_v36 = vld [vmem:[%s1269_s27 + $0xb8] sm:$0xff]  }
  0x1c   : > { %1102 = vmatpush3.bf16.msra.mxu1 %v1163_v14  ;;  %1063 = vmatprep.subr.bf16.mxu0 %v1164_v15 }
  0x1d   : > { %1103 = vmatprep.subr.bf16.mxu1 %v1165_v16 }
  0x1f   : > { %1064 = vmatpush3.bf16.msra.mxu0 %v1166_v17 }
  0x20   : > { %1104 = vmatpush3.bf16.msra.mxu1 %v1167_v18  ;;  %1065 = vmatprep.subr.bf16.mxu0 %v1168_v19 }
  0x21   : > { %1105 = vmatprep.subr.bf16.mxu1 %v1169_v20 }
  0x23   : > { %1066 = vmatpush3.bf16.msra.mxu0 %v1170_v21 }
  0x24   : > { %1106 = vmatpush3.bf16.msra.mxu1 %v1171_v22  ;;  %1067 = vmatprep.subr.bf16.mxu0 %v1172_v23 }
  0x25   : > { %1107 = vmatprep.subr.bf16.mxu1 %v1173_v24 }
  0x27   : > { %1068 = vmatpush3.bf16.msra.mxu0 %v1174_v25 }
  0x28   : > { %1108 = vmatpush3.bf16.msra.mxu1 %v1175_v26  ;;  %1069 = vmatprep.subr.bf16.mxu0 %v1176_v27 }
  0x29   : > { %1109 = vmatprep.subr.bf16.mxu1 %v1177_v28 }
  0x2b   : > { %1070 = vmatpush3.bf16.msra.mxu0 %v1178_v29 }
  0x2c   : > { %1110 = vmatpush3.bf16.msra.mxu1 %v1179_v30  ;;  %1071 = vmatprep.subr.bf16.mxu0 %v1180_v31 }
  0x2d   : > { %1111 = vmatprep.subr.bf16.mxu1 %v1181_v32 }
  0x2f   : > { %1072 = vmatpush3.bf16.msra.mxu0 %v1182_v34 }
  0x30   : > { %1112 = vmatpush3.bf16.msra.mxu1 %v1183_v36 }
  0x32   : > { %675 = vmatmul.mubr.bf16.vlgmr.msra.gmra.mrb[0].mxu0 %v1184_v33 }
  0x33   : > { %740 = vmatmul.mubr.bf16.vlgmr.msra.gmra.mrb[0].mxu1 %v1187_v35  ;;  %682 = vmatprep.mubr.bf16.mxu0 %v1190_v37 }
  0x34   : > { %747 = vmatprep.mubr.bf16.mxu1 %v1192_v38 }
  0x3a   : > { %683 = vmatmul.mubr.bf16.gmra.mrb[4].mxu0 %v1194_v42 }
  0x3b   : > { %748 = vmatmul.mubr.bf16.gmra.mrb[4].mxu1 %v1195_v44  ;;  %690 = vmatprep.mubr.bf16.mxu0 %v1196_v45 }
  0x3c   : > { %755 = vmatprep.mubr.bf16.mxu1 %v1198_v46 }
  0x42   : > { %691 = vmatmul.mubr.bf16.gmra.mrb[8].mxu0 %v1200_v50 }
  0x43   : > { %756 = vmatmul.mubr.bf16.gmra.mrb[8].mxu1 %v1201_v52  ;;  %698 = vmatprep.mubr.bf16.mxu0 %v1202_v53 }
  0x44   : > { %763 = vmatprep.mubr.bf16.mxu1 %v1204_v54 }
  0x4a   : > { %699 = vmatmul.mubr.bf16.gmra.mrb[12].mxu0 %v1206_v55 }
  0x4b   : > { %764 = vmatmul.mubr.bf16.gmra.mrb[12].mxu1 %v1207_v56 }
  0x88   : > { %v333_v57 = vpop.permute.xlu0 %332  ;;  %v343_v10 = vpop.permute.xlu1 %342 }
  0x8c   : > { %v338_v59 = vpop.permute.xlu0 %337  ;;  %v348_v24 = vpop.permute.xlu1 %347 }
  0x90   : > { %v353_v29 = vpop.permute.xlu0 %352 }
  0x91   : > { %v358_v47 = vpop.permute.xlu1 %357 }
  0x94   : > { %v363_v52 = vpop.permute.xlu0 %362 }
 0x105   : > { %v1073_v58 = vpop.f32.mrb[0].mxu0 }
 0x106   : > { %v1113_v60 = vpop.f32.mrb[0].mxu1  ;;  %v1074_v61 = vpop.f32.mrb[1].mxu0 }
 0x107   : > { %v1075_v62 = vadd.f32 %v1074_v61, %v1073_v58  ;;  %v1114_v63 = vpop.f32.mrb[1].mxu1  ;;  %v1076_v0 = vpop.f32.mrb[2].mxu0 }
 0x108   : > { %v1115_v1 = vadd.f32 %v1114_v63, %v1113_v60  ;;  %v1116_v2 = vpop.f32.mrb[2].mxu1  ;;  %v1077_v3 = vpop.f32.mrb[3].mxu0 }
 0x109   : > { %v677_v4 = vadd.f32 %v1075_v62, %v333_v57  ;;  %v1078_v5 = vadd.f32 %v1077_v3, %v1076_v0  ;;  %v1117_v6 = vpop.f32.mrb[3].mxu1 }
 0x10a   : > { %v1118_v7 = vadd.f32 %v1117_v6, %v1116_v2  ;;  %v368_v6 = vpop.permute.xlu1 %367 }
 0x10b   : > { %v1369_v8 = vadd.f32 %v1115_v1, %v677_v4  ;;  %v680_v9 = vadd.f32 %v1078_v5, %v338_v59 }
 0x10d   : > { %v1371_v11 = vadd.f32 %v1118_v7, %v680_v9  ;;  %v1079_v12 = vpop.f32.mrb[4].mxu0  ;;  %v773_v34 = vsel %vm772_vm0, %v1369_v8, 0.0 }
 0x10e   : > { %v1119_v13 = vpop.f32.mrb[4].mxu1  ;;  %v1080_v14 = vpop.f32.mrb[5].mxu0 }
 0x10f   : > { %v1081_v15 = vadd.f32 %v1080_v14, %v1079_v12  ;;  %v1120_v16 = vpop.f32.mrb[5].mxu1  ;;  %v1082_v17 = vpop.f32.mrb[6].mxu0  ;;  %v774_v28 = vsel %vm772_vm0, %v1371_v11, 0.0 }
 0x110   : > { %v1121_v18 = vadd.f32 %v1120_v16, %v1119_v13  ;;  %v1122_v19 = vpop.f32.mrb[6].mxu1  ;;  %v1083_v20 = vpop.f32.mrb[7].mxu0  ;;  %v775_v39 = vadd.f32 %v774_v28, %v773_v34 }
 0x111   : > { %v685_v21 = vadd.f32 %v1081_v15, %v343_v10  ;;  %v1084_v22 = vadd.f32 %v1083_v20, %v1082_v17  ;;  %v1123_v23 = vpop.f32.mrb[7].mxu1 }
 0x112   : > { %v1124_v25 = vadd.f32 %v1123_v23, %v1122_v19 }
 0x113   : > { %v1373_v26 = vadd.f32 %v1121_v18, %v685_v21  ;;  %v688_v27 = vadd.f32 %v1084_v22, %v348_v24 }
 0x115   : > { %v1377_v30 = vadd.f32 %v1124_v25, %v688_v27  ;;  %v1085_v31 = vpop.f32.mrb[8].mxu0  ;;  %v776_v35 = vsel %vm772_vm0, %v1373_v26, 0.0 }
 0x116   : > { %v1125_v32 = vpop.f32.mrb[8].mxu1  ;;  %v1086_v33 = vpop.f32.mrb[9].mxu0  ;;  %v777_v46 = vadd.f32 %v776_v35, %v775_v39 }
 0x117   : > { %v1087_v36 = vadd.f32 %v1086_v33, %v1085_v31  ;;  %v1126_v37 = vpop.f32.mrb[9].mxu1  ;;  %v1088_v38 = vpop.f32.mrb[10].mxu0  ;;  %v778_v49 = vsel %vm772_vm0, %v1377_v30, 0.0 }
 0x118   : > { %v1127_v40 = vadd.f32 %v1126_v37, %v1125_v32  ;;  %v1128_v41 = vpop.f32.mrb[10].mxu1  ;;  %v1089_v42 = vpop.f32.mrb[11].mxu0  ;;  %v779_v56 = vadd.f32 %v778_v49, %v777_v46 }
 0x119   : > { %v693_v43 = vadd.f32 %v1087_v36, %v353_v29  ;;  %v1090_v44 = vadd.f32 %v1089_v42, %v1088_v38  ;;  %v1129_v45 = vpop.f32.mrb[11].mxu1 }
 0x11a   : > { %v1130_v48 = vadd.f32 %v1129_v45, %v1128_v41 }
 0x11b   : > { %v758_v50 = vadd.f32 %v1127_v40, %v693_v43  ;;  %v696_v51 = vadd.f32 %v1090_v44, %v358_v47 }
 0x11d   : > { %v780_v53 = vsel %vm772_vm0, %v758_v50, 0.0  ;;  %v761_v54 = vadd.f32 %v1130_v48, %v696_v51  ;;  %v1091_v55 = vpop.f32.mrb[12].mxu0 }
 0x11e   : > { %v1131_v57 = vpop.f32.mrb[12].mxu1  ;;  %v1092_v58 = vpop.f32.mrb[13].mxu0  ;;  %v781_v62 = vadd.f32 %v780_v53, %v779_v56 }
 0x11f   : > { %v1093_v59 = vadd.f32 %v1092_v58, %v1091_v55  ;;  %v1132_v60 = vpop.f32.mrb[13].mxu1  ;;  %v1094_v61 = vpop.f32.mrb[14].mxu0  ;;  %v782_v2 = vsel %vm772_vm0, %v761_v54, 0.0 }
 0x120   : > { %v1133_v63 = vadd.f32 %v1132_v60, %v1131_v57  ;;  %v1134_v0 = vpop.f32.mrb[14].mxu1  ;;  %v1095_v1 = vpop.f32.mrb[15].mxu0  ;;  %v783_v12 = vadd.f32 %v782_v2, %v781_v62  ;;  %v250_v2 = vld [vmem:[%s1467_s3] sm:$0xff] }
 0x121   : > { %v701_v3 = vadd.f32 %v1093_v59, %v363_v52  ;;  %v1096_v4 = vadd.f32 %v1095_v1, %v1094_v61  ;;  %v1135_v5 = vpop.f32.mrb[15].mxu1 }
 0x122   : > { %v1136_v7 = vadd.f32 %v1135_v5, %v1134_v0  ;;  %v253_v5 = vld [vmem:[%s1467_s3 + $0x18] sm:$0xff] }
 0x123   : > { %v766_v9 = vadd.f32 %v1133_v63, %v701_v3  ;;  %v704_v10 = vadd.f32 %v1096_v4, %v368_v6  ;;  %v251_v3 = vld [vmem:[%s1467_s3 + $0x8] sm:$0xff]  ;;  %v252_v4 = vld [vmem:[%s1467_s3 + $0x10] sm:$0xff] }
 0x125   : > { %v769_v13 = vadd.f32 %v1136_v7, %v704_v10  ;;  %v784_v14 = vsel %vm772_vm0, %v766_v9, 0.0  ;;  %v254_v7 = vld [vmem:[%s1467_s3 + $0x20] sm:$0xff]  ;;  %v256_v10 = vld [vmem:[%s1467_s3 + $0x30] sm:$0xff] }
 0x126   : > { %v785_v15 = vadd.f32 %v784_v14, %v783_v12  ;;  %v257_v12 = vld [vmem:[%s1467_s3 + $0x38] sm:$0xff]  ;;  %v259_v14 = vld [vmem:[%s1468_s4 + $0x8] sm:$0xff] }
 0x127   : > { %v786_v16 = vsel %vm772_vm0, %v769_v13, 0.0 }
 0x128   : > { %v787_v17 = vadd.f32 %v786_v16, %v785_v15 }
 0x12a   : > { %788 = vadd.xlane.f32.xlu0 %v787_v17 }
 0x1b7   : > { %v789_v18 = vpop.xlane.xlu0 %788 }
 0x1b8   : > { %v790_v19 = vrot.slane %v789_v18, 4 }
 0x1ba   : > { %v791_v20 = vadd.f32 %v790_v19, %v789_v18  ;;  %v260_v19 = vld [vmem:[%s1468_s4 + $0x10] sm:$0xff] }
 0x1bc   : > { %v792_v21 = vrot.slane %v791_v20, 2 }
 0x1be   : > { %v793_v22 = vadd.f32 %v792_v21, %v791_v20  ;;  %v261_v20 = vld [vmem:[%s1468_s4 + $0x18] sm:$0xff]  ;;  %v262_v21 = vld [vmem:[%s1468_s4 + $0x20] sm:$0xff] }
 0x1c0   : > { %v794_v23 = vrot.slane %v793_v22, 1 }
 0x1c2   : > { %v795_v24 = vadd.f32 %v794_v23, %v793_v22 }
 0x1c4   : > { %1137 = vpush %v795_v24 }
 0x1f5   : > { %s1138_s26 = spop %1137 }
 0x1f6   : > { %v797_v25 = vstv %s1138_s26 }
 0x1f7   : > { %v799_v27 = vmul.f32 0.00024414063, %v797_v25 }
 0x1f9   : > { %v800_v28 = vsub.f32 %v1369_v8, %v799_v27  ;;  %v801_v29 = vsub.f32 %v1371_v11, %v799_v27  ;;  %v802_v31 = vsub.f32 %v1373_v26, %v799_v27  ;;  %v803_v32 = vsub.f32 %v1377_v30, %v799_v27 }
 0x1fa   : > { %v804_v33 = vsub.f32 %v758_v50, %v799_v27  ;;  %v805_v37 = vsub.f32 %v761_v54, %v799_v27  ;;  %v806_v42 = vsub.f32 %v766_v9, %v799_v27  ;;  %v807_v44 = vsub.f32 %v769_v13, %v799_v27  ;;  %v255_v9 = vld [vmem:[%s1467_s3 + $0x28] sm:$0xff]  ;;  %v258_v13 = vld [vmem:[%s1468_s4] sm:$0xff] }
 0x1fb   : > { %v808_v34 = vmul.f32 %v800_v28, %v800_v28  ;;  %v809_v35 = vmul.f32 %v801_v29, %v801_v29  ;;  %v810_v36 = vmul.f32 %v802_v31, %v802_v31  ;;  %v811_v38 = vmul.f32 %v803_v32, %v803_v32  ;;  %v263_v27 = vld [vmem:[%s1468_s4 + $0x28] sm:$0xff] }
 0x1fc   : > { %v812_v43 = vmul.f32 %v804_v33, %v804_v33  ;;  %v813_v26 = vmul.f32 %v805_v37, %v805_v37  ;;  %v814_v46 = vmul.f32 %v806_v42, %v806_v42  ;;  %v815_v49 = vmul.f32 %v807_v44, %v807_v44 }
 0x1fd   : > { %v816_v39 = vsel %vm772_vm0, %v808_v34, 0.0  ;;  %v817_v40 = vsel %vm772_vm0, %v809_v35, 0.0  ;;  %v819_v8 = vsel %vm772_vm0, %v810_v36, 0.0  ;;  %v821_v30 = vsel %vm772_vm0, %v811_v38, 0.0 }
 0x1fe   : > { %v818_v41 = vadd.f32 %v817_v40, %v816_v39  ;;  %v823_v47 = vsel %vm772_vm0, %v812_v43, 0.0  ;;  %v825_v50 = vsel %vm772_vm0, %v813_v26, 0.0  ;;  %v827_v52 = vsel %vm772_vm0, %v814_v46, 0.0 }
 0x1ff   : > { %v829_v54 = vsel %vm772_vm0, %v815_v49, 0.0 }
 0x200   : > { %v820_v11 = vadd.f32 %v819_v8, %v818_v41 }
 0x202   : > { %v822_v45 = vadd.f32 %v821_v30, %v820_v11 }
 0x204   : > { %v824_v48 = vadd.f32 %v823_v47, %v822_v45 }
 0x206   : > { %v826_v51 = vadd.f32 %v825_v50, %v824_v48 }
 0x208   : > { %v828_v53 = vadd.f32 %v827_v52, %v826_v51 }
 0x20a   : > { %v830_v55 = vadd.f32 %v829_v54, %v828_v53 }
 0x20c   : > { %831 = vadd.xlane.f32.xlu1 %v830_v55 }
 0x299   : > { %v832_v56 = vpop.xlane.xlu1 %831 }
 0x29a   : > { %v833_v57 = vrot.slane %v832_v56, 4 }
 0x29c   : > { %v834_v58 = vadd.f32 %v833_v57, %v832_v56 }
 0x29e   : > { %v835_v59 = vrot.slane %v834_v58, 2 }
 0x2a0   : > { %v836_v60 = vadd.f32 %v835_v59, %v834_v58 }
 0x2a2   : > { %v837_v61 = vrot.slane %v836_v60, 1 }
 0x2a4   : > { %v838_v62 = vadd.f32 %v837_v61, %v836_v60 }
 0x2a6   : > { %1139 = vpush %v838_v62 }
 0x2d7   : > { %s1140_s27 = spop %1139 }
 0x2d8   : > { %v840_v63 = vstv %s1140_s27 }
 0x2d9   : > { %v841_v0 = vmul.f32 0.00024414063, %v840_v63 }
 0x2db   : > { %v842_v1 = vadd.f32 1e-05, %v841_v0 }
 0x2dd   : > { %1208 = vrsqrt.f32 %v842_v1 }
 0x2e7   : > { %v1209_v6 = vpop.eup %1208 }
 0x2e8   : > { %v844_v15 = vmul.f32 %v1209_v6, %v800_v28  ;;  %v845_v16 = vmul.f32 %v1209_v6, %v801_v29  ;;  %v846_v17 = vmul.f32 %v1209_v6, %v802_v31  ;;  %v847_v18 = vmul.f32 %v1209_v6, %v803_v32  ;;  %v264_v28 = vld [vmem:[%s1468_s4 + $0x30] sm:$0xff]  ;;  %v265_v29 = vld [vmem:[%s1468_s4 + $0x38] sm:$0xff] }
 0x2e9   : > { %v848_v22 = vmul.f32 %v1209_v6, %v804_v33  ;;  %v849_v23 = vmul.f32 %v1209_v6, %v805_v37  ;;  %v850_v24 = vmul.f32 %v1209_v6, %v806_v42  ;;  %v851_v25 = vmul.f32 %v1209_v6, %v807_v44 }
 0x2ea   : > { %v852_v31 = vmul.f32 %v844_v15, %v250_v2  ;;  %v853_v32 = vmul.f32 %v845_v16, %v251_v3  ;;  %v854_v33 = vmul.f32 %v846_v17, %v252_v4  ;;  %v855_v34 = vmul.f32 %v847_v18, %v253_v5 }
 0x2eb   : > { %v856_v35 = vmul.f32 %v848_v22, %v254_v7  ;;  %v857_v36 = vmul.f32 %v849_v23, %v255_v9  ;;  %v858_v37 = vmul.f32 %v850_v24, %v256_v10  ;;  %v859_v38 = vmul.f32 %v851_v25, %v257_v12 }
 0x2ec   : > { %v860_v39 = vadd.f32 %v852_v31, %v258_v13  ;;  %v861_v40 = vadd.f32 %v853_v32, %v259_v14  ;;  %v862_v41 = vadd.f32 %v854_v33, %v260_v19  ;;  %v863_v42 = vadd.f32 %v855_v34, %v261_v20 }
 0x2ed   : > { %v864_v43 = vadd.f32 %v856_v35, %v262_v21  ;;  %v865_v8 = vadd.f32 %v857_v36, %v263_v27  ;;  %v866_v11 = vadd.f32 %v858_v37, %v264_v28  ;;  %v867_v44 = vadd.f32 %v859_v38, %v265_v29 }
 0x2ee   : > { %v868_v26 = vmul.f32 0.2, %v860_v39  ;;  %v869_v30 = vmul.f32 0.2, %v861_v40  ;;  %v870_v45 = vmul.f32 0.2, %v862_v41 }
 0x2ef   : > { %v871_v46 = vmul.f32 0.2, %v863_v42  ;;  %v872_v47 = vmul.f32 0.2, %v864_v43  ;;  %v873_v48 = vmul.f32 0.2, %v865_v8 }
 0x2f0   : > { %v874_v49 = vmul.f32 0.2, %v866_v11  ;;  %v875_v50 = vmul.f32 0.2, %v867_v44  ;;  %v876_v51 = vmax.f32 %v860_v39, %v868_v26  ;;  %v877_v52 = vmax.f32 %v861_v40, %v869_v30 }
 0x2f1   : > { %v878_v53 = vmax.f32 %v862_v41, %v870_v45  ;;  %v879_v54 = vmax.f32 %v863_v42, %v871_v46  ;;  %v880_v55 = vmax.f32 %v864_v43, %v872_v47  ;;  %v881_v56 = vmax.f32 %v865_v8, %v873_v48 }
 0x2f2   : > { %v882_v57 = vmax.f32 %v866_v11, %v874_v49  ;;  %v883_v58 = vmax.f32 %v867_v44, %v875_v50  ;;  %v1049_v59 = vpack.c.bf16 %v876_v51, %v876_v51  ;;  %v1050_v60 = vpack.c.bf16 %v877_v52, %v877_v52 }
 0x2f3   : > { %v1051_v61 = vpack.c.bf16 %v878_v53, %v878_v53  ;;  %v1052_v62 = vpack.c.bf16 %v879_v54, %v879_v54  ;;  %v1053_v63 = vpack.c.bf16 %v880_v55, %v880_v55  ;;  %v1054_v0 = vpack.c.bf16 %v881_v56, %v881_v56 }
 0x2f4   : > { %v1055_v1 = vpack.c.bf16 %v882_v57, %v882_v57  ;;  %v1056_v2 = vpack.c.bf16 %v883_v58, %v883_v58  ;;  %917 = vst.msk [vmem:[%s224_s15] sm:$0xf] %vm916_vm1, %v1049_v59  ;;  %918 = vst.msk [vmem:[%s224_s15 + $0x4] sm:$0xf] %vm916_vm1, %v1050_v60 }
 0x2f5   : > { %919 = vst.msk [vmem:[%s224_s15 + $0x8] sm:$0xf] %vm916_vm1, %v1051_v61  ;;  %920 = vst.msk [vmem:[%s224_s15 + $0xc] sm:$0xf] %vm916_vm1, %v1052_v62 }
 0x2f6   : > { %921 = vst.msk [vmem:[%s224_s15 + $0x10] sm:$0xf] %vm916_vm1, %v1053_v63  ;;  %922 = vst.msk [vmem:[%s224_s15 + $0x14] sm:$0xf] %vm916_vm1, %v1054_v0 }
 0x2f7   : > { %923 = vst.msk [vmem:[%s224_s15 + $0x18] sm:$0xf] %vm916_vm1, %v1055_v1  ;;  %924 = vst.msk [vmem:[%s224_s15 + $0x1c] sm:$0xf] %vm916_vm1, %v1056_v2 }
 0x2f8 PF: > { %s15_s18 = sadd.s32 1, %s1216_s18  }
 0x2f9   : > { %p12_p4 = scmp.ge.s32.totalorder %s15_s18, 4  }
 0x2fb   :  { %14 = sbr.rel (!%p12_p4) target bundleno = 1 (0x1), region = 70 }

// kernel: critic_forward.7
= control target key start
LH: loop header
LB: loop body
LE: loop exit
PB: predicated region body
PF: predicated region fallthrough
CT: control target
= control target key end

     0   :  { %s1416_s26 = smov 0   ;;  %s1661_s0 = inlined_call_operand.vmem [shape: bf16[32,1024], index: 0, kind: input, shape index: {}]   ;;  %s1662_s1 = inlined_call_operand.vmem [shape: bf16[1024,128], index: 1, kind: input, shape index: {}]   ;;  %s1663_s2 = inlined_call_operand.vmem [shape: f32[1,128], index: 2, kind: input, shape index: {}]   ;;  %s1664_s3 = inlined_call_operand.vmem [shape: f32[16,128], index: 3, kind: input, shape index: {}]   ;;  %s1665_s4 = inlined_call_operand.vmem [shape: f32[16,128], index: 4, kind: input, shape index: {}]   ;;  %s1666_s5 = inlined_call_operand.vmem [shape: f32[16,128], index: 5, kind: input, shape index: {}]   ;;  %s1667_s6 = inlined_call_operand.<no memory space> [shape: f32[1], index: 6, kind: input, shape index: {}]   ;;  %s1668_s7 = inlined_call_operand.vmem [shape: f32[2,1,1], index: 7, kind: output, shape index: {}]  }
   0x1   :  { %12 = sst [smem:[#allocation2]] %s1667_s6 }
   0x2 LB: > { %s1422_s27 = sadd.s32 4294967295, %s1371_s26   ;;  %p1123_p0 = scmp.ge.s32.totalorder %s1371_s26, 1  ;;  %s1371_s26 = sphi %s1416_s26, %s18_s26  }
   0x3   : > { %p240_p1 = scmp.lt.s32.totalorder %s1371_s26, 3 }
   0x5   : > { %p241_p2 = pnand %p1123_p0, %p240_p1 }
   0x6   : > { %v1299_v0 = vld [vmem:[%s1662_s1 + $0x40] sm:$0xff] (!%p241_p2)   ;;  %v1303_v4 = vld [vmem:[%s1662_s1 + $0x48] sm:$0xff] (!%p241_p2)   ;;  %v1307_v8 = vld [vmem:[%s1662_s1 + $0x50] sm:$0xff] (!%p241_p2)   ;;  %s1124_s14 = sshll.u32 (!%p241_p2), %s1422_s27, 1  ;;  %s1067_s22 = sld [smem:[#allocation2]] (!%p241_p2)  ;;  %vm1070_vm0 = vcmask (!%p241_p2), 0  }
   0x7   : > { %244 = sbr.rel (%p241_p2) target bundleno = 797 (0x31d), region = 48  ;;  %v1300_v1 = vld [vmem:[%s1662_s1 + $0xc0] sm:$0xff] (!%p241_p2)   ;;  %1203 = vmatprep.subr.bf16.mxu0 (!%p241_p2), %v1299_v0  ;;  %v1304_v5 = vld [vmem:[%s1662_s1 + $0xc8] sm:$0xff] (!%p241_p2)   ;;  %v1308_v9 = vld [vmem:[%s1662_s1 + $0xd0] sm:$0xff] (!%p241_p2)   ;;  %p272_p3 = scmp.lt.s32.totalorder (!%p241_p2), %s1124_s14, 3 }
   0x8   : > { %v1301_v2 = vld [vmem:[%s1662_s1] sm:$0xff] (!%p241_p2)   ;;  %1225 = vmatprep.subr.bf16.mxu1 (!%p241_p2), %v1300_v1  ;;  %v1305_v6 = vld [vmem:[%s1662_s1 + $0x8] sm:$0xff] (!%p241_p2)   ;;  %v1309_v10 = vld [vmem:[%s1662_s1 + $0x10] sm:$0xff] (!%p241_p2)   ;;  %p278_p4 = scmp.lt.s32.totalorder (!%p241_p2), %s1422_s27, 1 }
   0x9   : > { %v1302_v3 = vld [vmem:[%s1662_s1 + $0x80] sm:$0xff] (!%p241_p2)   ;;  %1204 = vmatpush3.bf16.msra.mxu0 (!%p241_p2), %v1301_v2  ;;  %v1306_v7 = vld [vmem:[%s1662_s1 + $0x88] sm:$0xff] (!%p241_p2)   ;;  %v1310_v11 = vld [vmem:[%s1662_s1 + $0x90] sm:$0xff] (!%p241_p2)  }
   0xa   : > { %1226 = vmatpush3.bf16.msra.mxu1 (!%p241_p2), %v1302_v3  ;;  %1205 = vmatprep.subr.bf16.mxu0 (!%p241_p2), %v1303_v4  ;;  %v1311_v12 = vld [vmem:[%s1662_s1 + $0x58] sm:$0xff] (!%p241_p2)   ;;  %v1315_v16 = vld [vmem:[%s1662_s1 + $0x60] sm:$0xff] (!%p241_p2)   ;;  %v1319_v20 = vld [vmem:[%s1662_s1 + $0x68] sm:$0xff] (!%p241_p2)  }
   0xb   : > { %1227 = vmatprep.subr.bf16.mxu1 (!%p241_p2), %v1304_v5  ;;  %v1312_v13 = vld [vmem:[%s1662_s1 + $0xd8] sm:$0xff] (!%p241_p2)   ;;  %v1316_v17 = vld [vmem:[%s1662_s1 + $0xe0] sm:$0xff] (!%p241_p2)   ;;  %v1320_v21 = vld [vmem:[%s1662_s1 + $0xe8] sm:$0xff] (!%p241_p2)  }
   0xc   : > { %v1313_v14 = vld [vmem:[%s1662_s1 + $0x18] sm:$0xff] (!%p241_p2)   ;;  %v1317_v18 = vld [vmem:[%s1662_s1 + $0x20] sm:$0xff] (!%p241_p2)   ;;  %v1321_v22 = vld [vmem:[%s1662_s1 + $0x28] sm:$0xff] (!%p241_p2)  }
   0xd   : > { %1206 = vmatpush3.bf16.msra.mxu0 (!%p241_p2), %v1305_v6  ;;  %v1314_v15 = vld [vmem:[%s1662_s1 + $0x98] sm:$0xff] (!%p241_p2)   ;;  %v1318_v19 = vld [vmem:[%s1662_s1 + $0xa0] sm:$0xff] (!%p241_p2)   ;;  %v1322_v23 = vld [vmem:[%s1662_s1 + $0xa8] sm:$0xff] (!%p241_p2)  }
   0xe   : > { %1228 = vmatpush3.bf16.msra.mxu1 %v1306_v7  ;;  %1207 = vmatprep.subr.bf16.mxu0 %v1307_v8  ;;  %s1670_s14 = smov (!%p272_p3, %s1124_s14), 3  ;;  %v1323_v24 = vld [vmem:[%s1662_s1 + $0x70] sm:$0xff]   ;;  %v1327_v28 = vld [vmem:[%s1662_s1 + $0x78] sm:$0xff]   ;;  %v1331_v40 = vld [vmem:[%s1662_s1 + $0x140] sm:$0xff]   ;;  %s1672_s27 = smov (!%p278_p4, %s1422_s27), 1 }
   0xf   : > { %1229 = vmatprep.subr.bf16.mxu1 %v1308_v9  ;;  %v1324_v25 = vld [vmem:[%s1662_s1 + $0xf0] sm:$0xff]   ;;  %s1202_s16 = sshll.u32 %s1670_s14, 5  ;;  %v1328_v29 = vld [vmem:[%s1662_s1 + $0xf8] sm:$0xff]   ;;  %v1332_v41 = vld [vmem:[%s1662_s1 + $0x1c0] sm:$0xff]   ;;  %s280_s14 = scalar_lea.vmem %s1668_s7, %s1672_s27 }
  0x10   : > { %v1325_v26 = vld [vmem:[%s1662_s1 + $0x30] sm:$0xff]   ;;  %s1520_s25 = scalar_lea.vmem %s1661_s0, %s1202_s16  ;;  %v1329_v30 = vld [vmem:[%s1662_s1 + $0x38] sm:$0xff]   ;;  %v1333_v42 = vld [vmem:[%s1662_s1 + $0x100] sm:$0xff]  }
  0x11   : > { %1208 = vmatpush3.bf16.msra.mxu0 %v1309_v10  ;;  %v1326_v27 = vld [vmem:[%s1662_s1 + $0xb0] sm:$0xff]   ;;  %v1330_v31 = vld [vmem:[%s1662_s1 + $0xb8] sm:$0xff]   ;;  %v282_v32 = vld [vmem:[%s1520_s25] sm:$0xff] }
  0x12   : > { %1230 = vmatpush3.bf16.msra.mxu1 %v1310_v11  ;;  %1209 = vmatprep.subr.bf16.mxu0 %v1311_v12  ;;  %v286_v33 = vld [vmem:[%s1520_s25 + $0x20] sm:$0xff]  ;;  %v283_v34 = vld [vmem:[%s1520_s25 + $0x8] sm:$0xff]  ;;  %v1339_v48 = vld [vmem:[%s1662_s1 + $0x150] sm:$0xff]  }
  0x13   : > { %1231 = vmatprep.subr.bf16.mxu1 %v1312_v13  ;;  %v1128_v35 = vcombine.low %v282_v32, %v286_v33  ;;  %v1129_v36 = vcombine.high %v282_v32, %v286_v33  ;;  %v287_v37 = vld [vmem:[%s1520_s25 + $0x28] sm:$0xff]  ;;  %v1334_v43 = vld [vmem:[%s1662_s1 + $0x180] sm:$0xff]   ;;  %v1340_v49 = vld [vmem:[%s1662_s1 + $0x1d0] sm:$0xff]  }
  0x14   : > { %v1130_v38 = vcombine.low %v283_v34, %v287_v37  ;;  %v1131_v39 = vcombine.high %v283_v34, %v287_v37  ;;  %v1335_v44 = vld [vmem:[%s1662_s1 + $0x148] sm:$0xff]   ;;  %v1341_v50 = vld [vmem:[%s1662_s1 + $0x110] sm:$0xff]   ;;  %v1343_v52 = vld [vmem:[%s1662_s1 + $0x158] sm:$0xff]  }
  0x15   : > { %1210 = vmatpush3.bf16.msra.mxu0 %v1313_v14  ;;  %881 = vmatprep.mubr.bf16.mxu0 %v1129_v36  ;;  %v1336_v45 = vld [vmem:[%s1662_s1 + $0x1c8] sm:$0xff]   ;;  %v1342_v51 = vld [vmem:[%s1662_s1 + $0x190] sm:$0xff]   ;;  %v1344_v53 = vld [vmem:[%s1662_s1 + $0x1d8] sm:$0xff]  }
  0x16   : > { %1232 = vmatpush3.bf16.msra.mxu1 %v1314_v15  ;;  %1211 = vmatprep.subr.bf16.mxu0 %v1315_v16  ;;  %v1337_v46 = vld [vmem:[%s1662_s1 + $0x108] sm:$0xff]   ;;  %v1345_v54 = vld [vmem:[%s1662_s1 + $0x118] sm:$0xff]   ;;  %v1347_v56 = vld [vmem:[%s1662_s1 + $0x160] sm:$0xff]  }
  0x17   : > { %1233 = vmatprep.subr.bf16.mxu1 %v1316_v17  ;;  %922 = vmatprep.mubr.bf16.mxu1 %v1131_v39  ;;  %v1338_v47 = vld [vmem:[%s1662_s1 + $0x188] sm:$0xff]   ;;  %v1346_v55 = vld [vmem:[%s1662_s1 + $0x198] sm:$0xff]   ;;  %v1348_v57 = vld [vmem:[%s1662_s1 + $0x1e0] sm:$0xff]  }
  0x18   : > { %v1349_v58 = vld [vmem:[%s1662_s1 + $0x120] sm:$0xff]   ;;  %v1351_v60 = vld [vmem:[%s1662_s1 + $0x168] sm:$0xff]   ;;  %v1355_v0 = vld [vmem:[%s1662_s1 + $0x170] sm:$0xff]  }
  0x19   : > { %1212 = vmatpush3.bf16.msra.mxu0 %v1317_v18  ;;  %v1350_v59 = vld [vmem:[%s1662_s1 + $0x1a0] sm:$0xff]   ;;  %v1352_v61 = vld [vmem:[%s1662_s1 + $0x1e8] sm:$0xff]   ;;  %v1356_v1 = vld [vmem:[%s1662_s1 + $0x1f0] sm:$0xff]  }
  0x1a   : > { %1234 = vmatpush3.bf16.msra.mxu1 %v1318_v19  ;;  %1213 = vmatprep.subr.bf16.mxu0 %v1319_v20  ;;  %v1353_v62 = vld [vmem:[%s1662_s1 + $0x128] sm:$0xff]   ;;  %v1357_v2 = vld [vmem:[%s1662_s1 + $0x130] sm:$0xff]   ;;  %v1359_v4 = vld [vmem:[%s1662_s1 + $0x178] sm:$0xff]  }
  0x1b   : > { %1235 = vmatprep.subr.bf16.mxu1 %v1320_v21  ;;  %v1354_v63 = vld [vmem:[%s1662_s1 + $0x1a8] sm:$0xff]   ;;  %v1358_v3 = vld [vmem:[%s1662_s1 + $0x1b0] sm:$0xff]   ;;  %v1360_v5 = vld [vmem:[%s1662_s1 + $0x1f8] sm:$0xff]  }
  0x1c   : > { %v1361_v6 = vld [vmem:[%s1662_s1 + $0x138] sm:$0xff]   ;;  %v284_v8 = vld [vmem:[%s1520_s25 + $0x10] sm:$0xff]  ;;  %v1127_v18 = vld [vmem:[%s1663_s2] ss:$0 sm:$0xff] }
  0x1d   : > { %1214 = vmatpush3.bf16.msra.mxu0 %v1321_v22  ;;  %v1362_v7 = vld [vmem:[%s1662_s1 + $0x1b8] sm:$0xff]   ;;  %v288_v9 = vld [vmem:[%s1520_s25 + $0x30] sm:$0xff] }
  0x1e   : > { %1236 = vmatpush3.bf16.msra.mxu1 %v1322_v23  ;;  %1215 = vmatprep.subr.bf16.mxu0 %v1323_v24  ;;  %v1132_v10 = vcombine.low %v284_v8, %v288_v9  ;;  %v1133_v11 = vcombine.high %v284_v8, %v288_v9  ;;  %v285_v12 = vld [vmem:[%s1520_s25 + $0x18] sm:$0xff]  ;;  %v1042_v9 = vld [vmem:[%s1664_s3] sm:$0xff] }
  0x1f   : > { %1237 = vmatprep.subr.bf16.mxu1 %v1324_v25  ;;  %v289_v13 = vld [vmem:[%s1520_s25 + $0x38] sm:$0xff] }
  0x20   : > { %v1134_v14 = vcombine.low %v285_v12, %v289_v13  ;;  %v1135_v15 = vcombine.high %v285_v12, %v289_v13  ;;  %v1046_v13 = vld [vmem:[%s1665_s4] sm:$0xff] }
  0x21   : > { %1216 = vmatpush3.bf16.msra.mxu0 %v1325_v26 }
  0x22   : > { %1238 = vmatpush3.bf16.msra.mxu1 %v1326_v27  ;;  %1217 = vmatprep.subr.bf16.mxu0 %v1327_v28 }
  0x23   : > { %1239 = vmatprep.subr.bf16.mxu1 %v1328_v29 }
  0x25   : > { %1218 = vmatpush3.bf16.msra.mxu0 %v1329_v30 }
  0x26   : > { %1240 = vmatpush3.bf16.msra.mxu1 %v1330_v31  ;;  %1247 = vmatprep.subr.bf16.mxu0 %v1331_v40 }
  0x27   : > { %1269 = vmatprep.subr.bf16.mxu1 %v1332_v41 }
  0x28   : > { %882 = vmatmul.mubr.bf16.vlgmr.msra.gmra.mrb[0].mxu0 %v1128_v35 }
  0x29   : > { %923 = vmatmul.mubr.bf16.vlgmr.msra.gmra.mrb[0].mxu1 %v1130_v38  ;;  %1248 = vmatpush3.bf16.msra.mxu0 %v1333_v42 }
  0x2a   : > { %1270 = vmatpush3.bf16.msra.mxu1 %v1334_v43  ;;  %1249 = vmatprep.subr.bf16.mxu0 %v1335_v44 }
  0x2b   : > { %1271 = vmatprep.subr.bf16.mxu1 %v1336_v45  ;;  %963 = vmatprep.mubr.bf16.mxu0 %v1133_v11 }
  0x2c   : > { %1004 = vmatprep.mubr.bf16.mxu1 %v1135_v15 }
  0x2d   : > { %1250 = vmatpush3.bf16.msra.mxu0 %v1337_v46 }
  0x2e   : > { %1272 = vmatpush3.bf16.msra.mxu1 %v1338_v47  ;;  %1251 = vmatprep.subr.bf16.mxu0 %v1339_v48 }
  0x2f   : > { %1273 = vmatprep.subr.bf16.mxu1 %v1340_v49 }
  0x31   : > { %1252 = vmatpush3.bf16.msra.mxu0 %v1341_v50 }
  0x32   : > { %1274 = vmatpush3.bf16.msra.mxu1 %v1342_v51  ;;  %1253 = vmatprep.subr.bf16.mxu0 %v1343_v52 }
  0x33   : > { %1275 = vmatprep.subr.bf16.mxu1 %v1344_v53 }
  0x35   : > { %1254 = vmatpush3.bf16.msra.mxu0 %v1345_v54 }
  0x36   : > { %1276 = vmatpush3.bf16.msra.mxu1 %v1346_v55  ;;  %1255 = vmatprep.subr.bf16.mxu0 %v1347_v56 }
  0x37   : > { %1277 = vmatprep.subr.bf16.mxu1 %v1348_v57 }
  0x39   : > { %1256 = vmatpush3.bf16.msra.mxu0 %v1349_v58 }
  0x3a   : > { %1278 = vmatpush3.bf16.msra.mxu1 %v1350_v59  ;;  %1257 = vmatprep.subr.bf16.mxu0 %v1351_v60 }
  0x3b   : > { %1279 = vmatprep.subr.bf16.mxu1 %v1352_v61 }
  0x3d   : > { %1258 = vmatpush3.bf16.msra.mxu0 %v1353_v62 }
  0x3e   : > { %1280 = vmatpush3.bf16.msra.mxu1 %v1354_v63  ;;  %1259 = vmatprep.subr.bf16.mxu0 %v1355_v0 }
  0x3f   : > { %1281 = vmatprep.subr.bf16.mxu1 %v1356_v1 }
  0x41   : > { %1260 = vmatpush3.bf16.msra.mxu0 %v1357_v2 }
  0x42   : > { %1282 = vmatpush3.bf16.msra.mxu1 %v1358_v3  ;;  %1261 = vmatprep.subr.bf16.mxu0 %v1359_v4 }
  0x43   : > { %1283 = vmatprep.subr.bf16.mxu1 %v1360_v5 }
  0x45   : > { %1262 = vmatpush3.bf16.msra.mxu0 %v1361_v6 }
  0x46   : > { %1284 = vmatpush3.bf16.msra.mxu1 %v1362_v7 }
  0x48   : > { %964 = vmatmul.mubr.bf16.vlgmr.msra.gmra.mrb[4].mxu0 %v1132_v10  ;;  %v1043_v10 = vld [vmem:[%s1664_s3 + $0x8] sm:$0xff] }
  0x49   : > { %1005 = vmatmul.mubr.bf16.vlgmr.msra.gmra.mrb[4].mxu1 %v1134_v14  ;;  %v1047_v14 = vld [vmem:[%s1665_s4 + $0x8] sm:$0xff] }
  0xfb   : > { %v1219_v16 = vpop.f32.mrb[0].mxu0 }
  0xfc   : > { %v1241_v17 = vpop.f32.mrb[0].mxu1  ;;  %v1220_v19 = vpop.f32.mrb[1].mxu0 }
  0xfd   : > { %v1221_v20 = vadd.f32 %v1220_v19, %v1219_v16  ;;  %v1242_v21 = vpop.f32.mrb[1].mxu1  ;;  %v1222_v22 = vpop.f32.mrb[2].mxu0 }
  0xfe   : > { %v1243_v23 = vadd.f32 %v1242_v21, %v1241_v17  ;;  %v1244_v24 = vpop.f32.mrb[2].mxu1  ;;  %v1223_v25 = vpop.f32.mrb[3].mxu0  ;;  %v1054_v21 = vld [vmem:[%s1666_s5] sm:$0xff] }
  0xff   : > { %v884_v26 = vadd.f32 %v1221_v20, %v1127_v18  ;;  %v1224_v27 = vadd.f32 %v1223_v25, %v1222_v22  ;;  %v1245_v28 = vpop.f32.mrb[3].mxu1  ;;  %v1055_v22 = vld [vmem:[%s1666_s5 + $0x8] sm:$0xff] }
 0x100   : > { %v1246_v29 = vadd.f32 %v1245_v28, %v1244_v24 }
 0x101   : > { %v925_v30 = vadd.f32 %v1243_v23, %v884_v26  ;;  %v887_v31 = vadd.f32 %v1224_v27, %v1127_v18 }
 0x103   : > { %v928_v32 = vadd.f32 %v1246_v29, %v887_v31 }
 0x11b   : > { %v1263_v33 = vpop.f32.mrb[4].mxu0 }
 0x11c   : > { %v1285_v34 = vpop.f32.mrb[4].mxu1  ;;  %v1264_v35 = vpop.f32.mrb[5].mxu0 }
 0x11d   : > { %v1265_v36 = vadd.f32 %v1264_v35, %v1263_v33  ;;  %v1286_v37 = vpop.f32.mrb[5].mxu1  ;;  %v1266_v38 = vpop.f32.mrb[6].mxu0 }
 0x11e   : > { %v1287_v39 = vadd.f32 %v1286_v37, %v1285_v34  ;;  %v1288_v40 = vpop.f32.mrb[6].mxu1  ;;  %v1267_v41 = vpop.f32.mrb[7].mxu0  ;;  %v1068_v34 = vstv %s1067_s22 }
 0x11f   : > { %v966_v42 = vadd.f32 %v1265_v36, %v925_v30  ;;  %v1268_v43 = vadd.f32 %v1267_v41, %v1266_v38  ;;  %v1289_v44 = vpop.f32.mrb[7].mxu1 }
 0x120   : > { %v1290_v45 = vadd.f32 %v1289_v44, %v1288_v40 }
 0x121   : > { %v969_v46 = vadd.f32 %v1268_v43, %v928_v32  ;;  %v1007_v47 = vadd.f32 %v1287_v39, %v966_v42 }
 0x123   : > { %v1010_v48 = vadd.f32 %v1290_v45, %v969_v46 }
 0x125   : > { %v1013_v49 = vadd.f32 %v1010_v48, %v1007_v47 }
 0x127   : > { %1014 = vadd.xlane.f32.xlu0 %v1013_v49 }
 0x1b4   : > { %v1015_v50 = vpop.xlane.xlu0 %1014 }
 0x1b5   : > { %v1016_v51 = vrot.slane %v1015_v50, 4 }
 0x1b7   : > { %v1017_v52 = vadd.f32 %v1016_v51, %v1015_v50 }
 0x1b9   : > { %v1018_v53 = vrot.slane %v1017_v52, 2 }
 0x1bb   : > { %v1019_v54 = vadd.f32 %v1018_v53, %v1017_v52 }
 0x1bd   : > { %v1020_v55 = vrot.slane %v1019_v54, 1 }
 0x1bf   : > { %v1021_v56 = vadd.f32 %v1020_v55, %v1019_v54 }
 0x1c1   : > { %v1023_v57 = vmul.f32 0.00048828125, %v1021_v56 }
 0x1c3   : > { %v1024_v58 = vsub.f32 %v1007_v47, %v1023_v57  ;;  %v1025_v59 = vsub.f32 %v1010_v48, %v1023_v57 }
 0x1c5   : > { %v1026_v60 = vmul.f32 %v1024_v58, %v1024_v58  ;;  %v1027_v61 = vmul.f32 %v1025_v59, %v1025_v59 }
 0x1c7   : > { %v1028_v62 = vadd.f32 %v1027_v61, %v1026_v60 }
 0x1c9   : > { %1029 = vadd.xlane.f32.xlu0 %v1028_v62 }
 0x256   : > { %v1030_v63 = vpop.xlane.xlu0 %1029 }
 0x257   : > { %v1031_v0 = vrot.slane %v1030_v63, 4 }
 0x259   : > { %v1032_v1 = vadd.f32 %v1031_v0, %v1030_v63 }
 0x25b   : > { %v1033_v2 = vrot.slane %v1032_v1, 2 }
 0x25d   : > { %v1034_v3 = vadd.f32 %v1033_v2, %v1032_v1 }
 0x25f   : > { %v1035_v4 = vrot.slane %v1034_v3, 1 }
 0x261   : > { %v1036_v5 = vadd.f32 %v1035_v4, %v1034_v3 }
 0x263   : > { %v1037_v6 = vmul.f32 0.00048828125, %v1036_v5 }
 0x265   : > { %v1038_v7 = vadd.f32 1e-05, %v1037_v6 }
 0x267   : > { %1363 = vrsqrt.f32 %v1038_v7 }
 0x271   : > { %v1364_v8 = vpop.eup %1363 }
 0x272   : > { %v1040_v11 = vmul.f32 %v1364_v8, %v1024_v58  ;;  %v1041_v12 = vmul.f32 %v1364_v8, %v1025_v59 }
 0x274   : > { %v1044_v15 = vmul.f32 %v1042_v9, %v1040_v11  ;;  %v1045_v16 = vmul.f32 %v1043_v10, %v1041_v12 }
 0x276   : > { %v1048_v17 = vadd.f32 %v1046_v13, %v1044_v15  ;;  %v1049_v18 = vadd.f32 %v1047_v14, %v1045_v16 }
 0x278   : > { %v1050_v19 = vmul.f32 0.2, %v1048_v17  ;;  %v1051_v20 = vmul.f32 0.2, %v1049_v18 }
 0x27a   : > { %v1052_v23 = vmax.f32 %v1048_v17, %v1050_v19  ;;  %v1053_v24 = vmax.f32 %v1049_v18, %v1051_v20 }
 0x27c   : > { %v1056_v25 = vmul.f32 %v1054_v21, %v1052_v23  ;;  %v1057_v26 = vmul.f32 %v1055_v22, %v1053_v24 }
 0x27e   : > { %v1058_v27 = vadd.f32 %v1057_v26, %v1056_v25 }
 0x280   : > { %1059 = vadd.xlane.f32.xlu1 %v1058_v27 }
 0x30d   : > { %v1060_v28 = vpop.xlane.xlu1 %1059 }
 0x30e   : > { %v1061_v29 = vrot.slane %v1060_v28, 4 }
 0x310   : > { %v1062_v30 = vadd.f32 %v1061_v29, %v1060_v28 }
 0x312   : > { %v1063_v31 = vrot.slane %v1062_v30, 2 }
 0x314   : > { %v1064_v32 = vadd.f32 %v1063_v31, %v1062_v30 }
 0x316   : > { %v1065_v33 = vrot.slane %v1064_v32, 1 }
 0x318   : > { %v1066_v35 = vadd.f32 %v1065_v33, %v1064_v32 }
 0x31a   : > { %v1069_v36 = vadd.f32 %v1068_v34, %v1066_v35 }
 0x31c   : > { %1071 = vst.msk [vmem:[%s280_s14] sm:$0x1] %vm1070_vm0, %v1069_v36 }
 0x31d PF: > { %s18_s26 = sadd.s32 1, %s1371_s26  }
 0x31e   : > { %p15_p5 = scmp.ge.s32.totalorder %s18_s26, 4  }
 0x320   :  { %17 = sbr.rel (!%p15_p5) target bundleno = 2 (0x2), region = 78 }

</bundles_post_ra>
